<compile_context>
chip_gen: v7x
topology: tpu7x:2x2x1
jax: 0.10.0
libtpu: 0.0.40
codegen_flags: <defaults>
</compile_context>

<pallas_src>
import jax
import jax.numpy as jnp
from jax.experimental import pallas as pl
from jax.experimental.pallas import tpu as pltpu

_LANE = 128


def _round_up(v, m):
    return ((v + m - 1) // m) * m


def _vae_kernel(x_ref, w1_ref, b1_ref, wh_ref, bh_ref, w2_ref, b2_ref,
                w3_ref, b3_ref, eps_ref, xnew_ref, musig_ref):
    # encode: h = relu(x @ W1 + b1)      (bf16 operands, f32 accumulate)
    h = jnp.dot(x_ref[...], w1_ref[...],
                preferred_element_type=jnp.float32) + b1_ref[...]
    h = jnp.maximum(h, 0.0)

    # fused mu|sigma heads: single MXU push over 2*Z_pad output lanes.
    ms = jnp.dot(h.astype(jnp.bfloat16), wh_ref[...],
                 preferred_element_type=jnp.float32) + bh_ref[...]
    zp = wh_ref.shape[1] // 2
    mu = ms[:, :zp]
    sigma = ms[:, zp:]

    # reparameterization: z = mu + sigma * epsilon   (f32 elementwise)
    z = mu + sigma * eps_ref[...]

    # decode: h2 = relu(z @ W2 + b2); x_new = sigmoid(h2 @ W3 + b3)
    h2 = jnp.dot(z.astype(jnp.bfloat16), w2_ref[...],
                 preferred_element_type=jnp.float32) + b2_ref[...]
    h2 = jnp.maximum(h2, 0.0)
    logits = jnp.dot(h2.astype(jnp.bfloat16), w3_ref[...],
                     preferred_element_type=jnp.float32) + b3_ref[...]

    # sigmoid: exp on the EUP, approx reciprocal also on the EUP (frees VALU).
    xnew_ref[...] = pl.reciprocal(1.0 + jnp.exp(-logits),
                                  approx=True).astype(xnew_ref.dtype)
    musig_ref[...] = ms.astype(musig_ref.dtype)


def init_params(key, input_dim, hidden_dim, z_dim):
    """PyTorch nn.Linear-style init: U(-1/sqrt(fan_in), 1/sqrt(fan_in)).

    Weights are pre-transposed to (in_features, out_features) and round-tripped
    through bf16 so the reference and the kernel use identical operands.
    """
    def linear(k, fan_in, fan_out):
        kw, kb = jax.random.split(k)
        bound = 1.0 / jnp.sqrt(fan_in)
        w = jax.random.uniform(kw, (fan_in, fan_out), jnp.float32, -bound, bound)
        b = jax.random.uniform(kb, (1, fan_out), jnp.float32, -bound, bound)
        return w, b

    k1, k2, k3, k4, k5 = jax.random.split(key, 5)
    w1, b1 = linear(k1, input_dim, hidden_dim)      # img_2hid
    wmu, bmu = linear(k2, hidden_dim, z_dim)        # hidden_mu
    wsig, bsig = linear(k3, hidden_dim, z_dim)      # hidden_sigma
    w2, b2 = linear(k4, z_dim, hidden_dim)          # z_2hid
    w3, b3 = linear(k5, hidden_dim, input_dim)      # hidden_2img
    params = {"w1": w1, "b1": b1, "wmu": wmu, "bmu": bmu,
              "wsig": wsig, "bsig": bsig, "w2": w2, "b2": b2,
              "w3": w3, "b3": b3}
    for k in ("w1", "wmu", "wsig", "w2", "w3"):
        params[k] = params[k].astype(jnp.bfloat16).astype(jnp.float32)
    return params


def pack_params(params, input_dim, hidden_dim, z_dim):
    """Zero-pad feature dims to multiples of 128, fuse mu|sigma heads into a
    single (H_pad, 2*Z_pad) weight, and cast weights to bf16 (biases stay f32,
    added after the f32 accumulation)."""
    dp = _round_up(input_dim, _LANE)
    hp = _round_up(hidden_dim, _LANE)
    zp = _round_up(z_dim, _LANE)

    def pad(a, shape):
        return jnp.zeros(shape, a.dtype).at[:a.shape[0], :a.shape[1]].set(a)

    wh = jnp.concatenate(
        [pad(params["wmu"], (hp, zp)), pad(params["wsig"], (hp, zp))], axis=1)
    bh = jnp.concatenate(
        [pad(params["bmu"], (1, zp)), pad(params["bsig"], (1, zp))], axis=1)

    packed = {
        "w1": pad(params["w1"], (dp, hp)).astype(jnp.bfloat16),
        "b1": pad(params["b1"], (1, hp)),
        "wh": wh.astype(jnp.bfloat16),
        "bh": bh,
        "w2": pad(params["w2"], (zp, hp)).astype(jnp.bfloat16),
        "b2": pad(params["b2"], (1, hp)),
        "w3": pad(params["w3"], (hp, dp)).astype(jnp.bfloat16),
        "b3": pad(params["b3"], (1, dp)),
    }
    return packed, (dp, hp, zp)


def vae_forward(x, epsilon, packed, *, tile_b=256):
    """Run the VAE forward pass. Returns (x_new, mu, sigma) at logical shapes.

    tile_b: rows per grid step. 256 fills the v6e/v7x MXU M dimension; each
    tile is a few hundred KB even at input_dim~1024, so double-buffered tiles
    plus resident weights fit comfortably in v7x's 64 MiB VMEM.
    """
    B, input_dim = x.shape
    z_dim = epsilon.shape[1]
    dp, hp = packed["w1"].shape
    zp = packed["w2"].shape[0]

    tb = min(tile_b, _round_up(B, 8))
    bp = _round_up(B, tb)

    # pad batch/features with zeros; activations fed to the MXU go in as bf16.
    xp = jnp.zeros((bp, dp), jnp.bfloat16).at[:B, :input_dim].set(
        x.astype(jnp.bfloat16))
    ep = jnp.zeros((bp, zp), jnp.float32).at[:B, :z_dim].set(
        epsilon.astype(jnp.float32))

    grid = (bp // tb,)

    def row_spec(width):
        return pl.BlockSpec((tb, width), lambda i: (i, 0))

    def full_spec(a):
        return pl.BlockSpec(a.shape, lambda i: (0, 0))   # VMEM-resident weights

    in_specs = [
        row_spec(dp),
        full_spec(packed["w1"]), full_spec(packed["b1"]),
        full_spec(packed["wh"]), full_spec(packed["bh"]),
        full_spec(packed["w2"]), full_spec(packed["b2"]),
        full_spec(packed["w3"]), full_spec(packed["b3"]),
        row_spec(zp),
    ]
    out_specs = (row_spec(dp), row_spec(2 * zp))
    out_shape = (jax.ShapeDtypeStruct((bp, dp), jnp.float32),
                 jax.ShapeDtypeStruct((bp, 2 * zp), jnp.float32))

    flops = 2 * bp * (dp * hp + hp * 2 * zp + zp * hp + hp * dp)
    bytes_accessed = (
        xp.size * 2 + ep.size * 4
        + sum(int(v.size) * v.dtype.itemsize for v in packed.values())
        + bp * dp * 4 + bp * 2 * zp * 4)
    cost = pl.CostEstimate(flops=int(flops), transcendentals=int(bp * dp),
                           bytes_accessed=int(bytes_accessed))

    xnew_p, musig_p = pl.pallas_call(
        _vae_kernel,
        grid=grid,
        in_specs=in_specs,
        out_specs=out_specs,
        out_shape=out_shape,
        compiler_params=pltpu.CompilerParams(
            dimension_semantics=("parallel",)),
        cost_estimate=cost,
    )(xp, packed["w1"], packed["b1"], packed["wh"], packed["bh"],
      packed["w2"], packed["b2"], packed["w3"], packed["b3"], ep)

    x_new = xnew_p[:B, :input_dim]
    mu = musig_p[:B, :z_dim]
    sigma = musig_p[:B, zp:zp + z_dim]
    return x_new, mu, sigma


def _reference_forward(x, params, epsilon):
    """Pure-JAX f32 reference matching the PyTorch module."""
    h = jnp.maximum(x @ params["w1"] + params["b1"], 0.0)
    mu = h @ params["wmu"] + params["bmu"]
    sigma = h @ params["wsig"] + params["bsig"]
    z = mu + sigma * epsilon
    h2 = jnp.maximum(z @ params["w2"] + params["b2"], 0.0)
    x_new = jax.nn.sigmoid(h2 @ params["w3"] + params["b3"])
    return x_new, mu, sigma


if __name__ == "__main__":
    # Module defaults (MNIST-style flattened image): input 784, hidden 200, z 20.
    batch, input_dim, hidden_dim, z_dim = 8, 784, 200, 20

    key = jax.random.PRNGKey(0)
    kx, keps, kparams = jax.random.split(key, 3)

    x = jax.random.uniform(kx, (batch, input_dim), jnp.float32)
    # torch.rand_like(sigma): uniform [0,1) noise, precomputed outside the kernel.
    epsilon = jax.random.uniform(keps, (batch, z_dim), jnp.float32)

    params = init_params(kparams, input_dim, hidden_dim, z_dim)
    packed, _ = pack_params(params, input_dim, hidden_dim, z_dim)

    x_new, mu, sigma = jax.block_until_ready(vae_forward(x, epsilon, packed))

    # Correctness vs pure-JAX f32 reference (bf16 matmul operands in kernel).
    x_ref, mu_ref, sigma_ref = _reference_forward(x, params, epsilon)
    assert x_new.shape == (batch, input_dim)
    assert mu.shape == (batch, z_dim) and sigma.shape == (batch, z_dim)
    assert jnp.allclose(mu, mu_ref, atol=2e-2), float(jnp.max(jnp.abs(mu - mu_ref)))
    assert jnp.allclose(sigma, sigma_ref, atol=2e-2), float(jnp.max(jnp.abs(sigma - sigma_ref)))
    assert jnp.allclose(x_new, x_ref, atol=2e-2), float(jnp.max(jnp.abs(x_new - x_ref)))

    print("KERNEL_OK")
</pallas_src>

<mosaic_0001>
module attributes {stable_mosaic.version = 11 : i64} {
  func.func @_vae_kernel(%arg0: i32, %arg1: memref<8x896xbf16, #tpu.memory_space<vmem>>, %arg2: memref<896x256xbf16, #tpu.memory_space<vmem>>, %arg3: memref<1x256xf32, #tpu.memory_space<vmem>>, %arg4: memref<256x256xbf16, #tpu.memory_space<vmem>>, %arg5: memref<1x256xf32, #tpu.memory_space<vmem>>, %arg6: memref<128x256xbf16, #tpu.memory_space<vmem>>, %arg7: memref<1x256xf32, #tpu.memory_space<vmem>>, %arg8: memref<256x896xbf16, #tpu.memory_space<vmem>>, %arg9: memref<1x896xf32, #tpu.memory_space<vmem>>, %arg10: memref<8x128xf32, #tpu.memory_space<vmem>>, %arg11: memref<8x896xf32, #tpu.memory_space<vmem>>, %arg12: memref<8x256xf32, #tpu.memory_space<vmem>>) attributes {dimension_semantics = [#tpu.dimension_semantics<parallel>], iteration_bounds = array<i64: 1>, scalar_prefetch = 0 : i64, scratch_operands = 0 : i64, tpu.core_type = #tpu.core_type<tc>, window_params = [{transform_indices = @transform_0, window_bounds = array<i64: 8, 896>}, {pipeline_mode = #tpu.pipeline_mode<synchronous>, transform_indices = @transform_1, window_bounds = array<i64: 896, 256>}, {pipeline_mode = #tpu.pipeline_mode<synchronous>, transform_indices = @transform_2, window_bounds = array<i64: 1, 256>}, {pipeline_mode = #tpu.pipeline_mode<synchronous>, transform_indices = @transform_3, window_bounds = array<i64: 256, 256>}, {pipeline_mode = #tpu.pipeline_mode<synchronous>, transform_indices = @transform_4, window_bounds = array<i64: 1, 256>}, {pipeline_mode = #tpu.pipeline_mode<synchronous>, transform_indices = @transform_5, window_bounds = array<i64: 128, 256>}, {pipeline_mode = #tpu.pipeline_mode<synchronous>, transform_indices = @transform_6, window_bounds = array<i64: 1, 256>}, {pipeline_mode = #tpu.pipeline_mode<synchronous>, transform_indices = @transform_7, window_bounds = array<i64: 256, 896>}, {pipeline_mode = #tpu.pipeline_mode<synchronous>, transform_indices = @transform_8, window_bounds = array<i64: 1, 896>}, {transform_indices = @transform_9, window_bounds = array<i64: 8, 128>}, {transform_indices = @transform_10, window_bounds = array<i64: 8, 896>}, {transform_indices = @transform_11, window_bounds = array<i64: 8, 256>}]} {
    %c0 = arith.constant 0 : index
    %c0_0 = arith.constant 0 : index
    %0 = vector.load %arg1[%c0, %c0_0] : memref<8x896xbf16, #tpu.memory_space<vmem>>, vector<8x896xbf16>
    %c0_1 = arith.constant 0 : index
    %c0_2 = arith.constant 0 : index
    %1 = vector.load %arg2[%c0_1, %c0_2] : memref<896x256xbf16, #tpu.memory_space<vmem>>, vector<896x256xbf16>
    %cst = arith.constant dense<0.000000e+00> : vector<8x256xf32>
    %2 = tpu.matmul %0, %1, %cst {dimension_numbers = #tpu.dot_dimension_numbers<[1], [0], [0], [1], [0, 0, 1, 1], [], []>} : vector<8x896xbf16>, vector<896x256xbf16>, vector<8x256xf32> -> vector<8x256xf32>
    %c0_3 = arith.constant 0 : index
    %c0_4 = arith.constant 0 : index
    %3 = vector.load %arg3[%c0_3, %c0_4] : memref<1x256xf32, #tpu.memory_space<vmem>>, vector<1x256xf32>
    %4 = vector.broadcast %3 : vector<1x256xf32> to vector<8x256xf32>
    %5 = arith.addf %2, %4 : vector<8x256xf32>
    %cst_5 = arith.constant 0.000000e+00 : f32
    %6 = vector.broadcast %cst_5 : f32 to vector<8x256xf32>
    %7 = arith.maximumf %5, %6 : vector<8x256xf32>
    %8 = arith.truncf %7 : vector<8x256xf32> to vector<8x256xbf16>
    %c0_6 = arith.constant 0 : index
    %c0_7 = arith.constant 0 : index
    %9 = vector.load %arg4[%c0_6, %c0_7] : memref<256x256xbf16, #tpu.memory_space<vmem>>, vector<256x256xbf16>
    %cst_8 = arith.constant dense<0.000000e+00> : vector<8x256xf32>
    %10 = tpu.matmul %8, %9, %cst_8 {dimension_numbers = #tpu.dot_dimension_numbers<[1], [0], [0], [1], [0, 0, 1, 1], [], []>} : vector<8x256xbf16>, vector<256x256xbf16>, vector<8x256xf32> -> vector<8x256xf32>
    %c0_9 = arith.constant 0 : index
    %c0_10 = arith.constant 0 : index
    %11 = vector.load %arg5[%c0_9, %c0_10] : memref<1x256xf32, #tpu.memory_space<vmem>>, vector<1x256xf32>
    %12 = vector.broadcast %11 : vector<1x256xf32> to vector<8x256xf32>
    %13 = arith.addf %10, %12 : vector<8x256xf32>
    %14 = vector.extract_strided_slice %13 {offsets = [0, 0], sizes = [8, 128], strides = [1, 1]} : vector<8x256xf32> to vector<8x128xf32>
    %15 = vector.extract_strided_slice %13 {offsets = [0, 128], sizes = [8, 128], strides = [1, 1]} : vector<8x256xf32> to vector<8x128xf32>
    %c0_11 = arith.constant 0 : index
    %c0_12 = arith.constant 0 : index
    %16 = vector.load %arg10[%c0_11, %c0_12] : memref<8x128xf32, #tpu.memory_space<vmem>>, vector<8x128xf32>
    %17 = arith.mulf %15, %16 : vector<8x128xf32>
    %18 = arith.addf %14, %17 : vector<8x128xf32>
    %19 = arith.truncf %18 : vector<8x128xf32> to vector<8x128xbf16>
    %c0_13 = arith.constant 0 : index
    %c0_14 = arith.constant 0 : index
    %20 = vector.load %arg6[%c0_13, %c0_14] : memref<128x256xbf16, #tpu.memory_space<vmem>>, vector<128x256xbf16>
    %cst_15 = arith.constant dense<0.000000e+00> : vector<8x256xf32>
    %21 = tpu.matmul %19, %20, %cst_15 {dimension_numbers = #tpu.dot_dimension_numbers<[1], [0], [0], [1], [0, 0, 1, 1], [], []>} : vector<8x128xbf16>, vector<128x256xbf16>, vector<8x256xf32> -> vector<8x256xf32>
    %c0_16 = arith.constant 0 : index
    %c0_17 = arith.constant 0 : index
    %22 = vector.load %arg7[%c0_16, %c0_17] : memref<1x256xf32, #tpu.memory_space<vmem>>, vector<1x256xf32>
    %23 = vector.broadcast %22 : vector<1x256xf32> to vector<8x256xf32>
    %24 = arith.addf %21, %23 : vector<8x256xf32>
    %cst_18 = arith.constant 0.000000e+00 : f32
    %25 = vector.broadcast %cst_18 : f32 to vector<8x256xf32>
    %26 = arith.maximumf %24, %25 : vector<8x256xf32>
    %27 = arith.truncf %26 : vector<8x256xf32> to vector<8x256xbf16>
    %c0_19 = arith.constant 0 : index
    %c0_20 = arith.constant 0 : index
    %28 = vector.load %arg8[%c0_19, %c0_20] : memref<256x896xbf16, #tpu.memory_space<vmem>>, vector<256x896xbf16>
    %cst_21 = arith.constant dense<0.000000e+00> : vector<8x896xf32>
    %29 = tpu.matmul %27, %28, %cst_21 {dimension_numbers = #tpu.dot_dimension_numbers<[1], [0], [0], [1], [0, 0, 1, 1], [], []>} : vector<8x256xbf16>, vector<256x896xbf16>, vector<8x896xf32> -> vector<8x896xf32>
    %c0_22 = arith.constant 0 : index
    %c0_23 = arith.constant 0 : index
    %30 = vector.load %arg9[%c0_22, %c0_23] : memref<1x896xf32, #tpu.memory_space<vmem>>, vector<1x896xf32>
    %31 = vector.broadcast %30 : vector<1x896xf32> to vector<8x896xf32>
    %32 = arith.addf %29, %31 : vector<8x896xf32>
    %cst_24 = arith.constant 0.000000e+00 : f32
    %33 = vector.broadcast %cst_24 : f32 to vector<8x896xf32>
    %34 = arith.subf %33, %32 : vector<8x896xf32>
    %35 = math.exp %34 : vector<8x896xf32>
    %cst_25 = arith.constant 1.000000e+00 : f32
    %36 = vector.broadcast %cst_25 : f32 to vector<8x896xf32>
    %37 = arith.addf %36, %35 : vector<8x896xf32>
    %38 = tpu.reciprocal %37 {approx = true} : vector<8x896xf32> -> vector<8x896xf32>
    %c0_26 = arith.constant 0 : index
    %c0_27 = arith.constant 0 : index
    %39 = vector.load %arg11[%c0_26, %c0_27] : memref<8x896xf32, #tpu.memory_space<vmem>>, vector<8x896xf32>
    tpu.vector_store %arg11[%c0_26, %c0_27], %38 {strides = array<i32>} : memref<8x896xf32, #tpu.memory_space<vmem>>, vector<8x896xf32>,
    %c0_28 = arith.constant 0 : index
    %c0_29 = arith.constant 0 : index
    %40 = vector.load %arg12[%c0_28, %c0_29] : memref<8x256xf32, #tpu.memory_space<vmem>>, vector<8x256xf32>
    tpu.vector_store %arg12[%c0_28, %c0_29], %13 {strides = array<i32>} : memref<8x256xf32, #tpu.memory_space<vmem>>, vector<8x256xf32>,
    return
  }
  func.func @transform_0(%arg0: i32) -> (i32, i32) {
    %c0_i32 = arith.constant 0 : i32
    %c0_i32_0 = arith.constant 0 : i32
    return %arg0, %c0_i32 : i32, i32
  }
  func.func @transform_1(%arg0: i32) -> (i32, i32) {
    %c0_i32 = arith.constant 0 : i32
    %c0_i32_0 = arith.constant 0 : i32
    %c0_i32_1 = arith.constant 0 : i32
    return %c0_i32, %c0_i32_0 : i32, i32
  }
  func.func @transform_2(%arg0: i32) -> (i32, i32) {
    %c0_i32 = arith.constant 0 : i32
    %c0_i32_0 = arith.constant 0 : i32
    %c0_i32_1 = arith.constant 0 : i32
    return %c0_i32, %c0_i32_0 : i32, i32
  }
  func.func @transform_3(%arg0: i32) -> (i32, i32) {
    %c0_i32 = arith.constant 0 : i32
    %c0_i32_0 = arith.constant 0 : i32
    %c0_i32_1 = arith.constant 0 : i32
    return %c0_i32, %c0_i32_0 : i32, i32
  }
  func.func @transform_4(%arg0: i32) -> (i32, i32) {
    %c0_i32 = arith.constant 0 : i32
    %c0_i32_0 = arith.constant 0 : i32
    %c0_i32_1 = arith.constant 0 : i32
    return %c0_i32, %c0_i32_0 : i32, i32
  }
  func.func @transform_5(%arg0: i32) -> (i32, i32) {
    %c0_i32 = arith.constant 0 : i32
    %c0_i32_0 = arith.constant 0 : i32
    %c0_i32_1 = arith.constant 0 : i32
    return %c0_i32, %c0_i32_0 : i32, i32
  }
  func.func @transform_6(%arg0: i32) -> (i32, i32) {
    %c0_i32 = arith.constant 0 : i32
    %c0_i32_0 = arith.constant 0 : i32
    %c0_i32_1 = arith.constant 0 : i32
    return %c0_i32, %c0_i32_0 : i32, i32
  }
  func.func @transform_7(%arg0: i32) -> (i32, i32) {
    %c0_i32 = arith.constant 0 : i32
    %c0_i32_0 = arith.constant 0 : i32
    %c0_i32_1 = arith.constant 0 : i32
    return %c0_i32, %c0_i32_0 : i32, i32
  }
  func.func @transform_8(%arg0: i32) -> (i32, i32) {
    %c0_i32 = arith.constant 0 : i32
    %c0_i32_0 = arith.constant 0 : i32
    %c0_i32_1 = arith.constant 0 : i32
    return %c0_i32, %c0_i32_0 : i32, i32
  }
  func.func @transform_9(%arg0: i32) -> (i32, i32) {
    %c0_i32 = arith.constant 0 : i32
    %c0_i32_0 = arith.constant 0 : i32
    return %arg0, %c0_i32 : i32, i32
  }
  func.func @transform_10(%arg0: i32) -> (i32, i32) {
    %c0_i32 = arith.constant 0 : i32
    %c0_i32_0 = arith.constant 0 : i32
    return %arg0, %c0_i32 : i32, i32
  }
  func.func @transform_11(%arg0: i32) -> (i32, i32) {
    %c0_i32 = arith.constant 0 : i32
    %c0_i32_0 = arith.constant 0 : i32
    return %arg0, %c0_i32 : i32, i32
  }
}

</mosaic_0001>

<bundles_post_ra>
// kernel: tpu_custom_call.1
= control target key start
LH: loop header
LB: loop body
LE: loop exit
PB: predicated region body
PF: predicated region fallthrough
CT: control target
= control target key end

     0   :  { %17 = vsyncpa [#allocation3], 0  ;;  %s3620_s0 = inlined_call_operand.hbm [shape: bf16[8,896], index: 0, kind: input, shape index: {}]   ;;  %s3621_s1 = inlined_call_operand.hbm [shape: bf16[896,256], index: 1, kind: input, shape index: {}]   ;;  %s3622_s2 = inlined_call_operand.hbm [shape: f32[1,256], index: 2, kind: input, shape index: {}]   ;;  %s3623_s3 = inlined_call_operand.hbm [shape: bf16[256,256], index: 3, kind: input, shape index: {}]   ;;  %s3624_s4 = inlined_call_operand.hbm [shape: f32[1,256], index: 4, kind: input, shape index: {}]   ;;  %s3625_s5 = inlined_call_operand.hbm [shape: bf16[128,256], index: 5, kind: input, shape index: {}]   ;;  %s3626_s6 = inlined_call_operand.vmem [shape: f32[1,256], index: 6, kind: input, shape index: {}]   ;;  %s3627_s7 = inlined_call_operand.hbm [shape: bf16[256,896], index: 7, kind: input, shape index: {}]   ;;  %s3628_s8 = inlined_call_operand.vmem [shape: f32[1,896], index: 8, kind: input, shape index: {}]   ;;  %s3629_s9 = inlined_call_operand.vmem [shape: f32[8,128], index: 9, kind: input, shape index: {}]   ;;  %s3630_s10 = inlined_call_operand.hbm [shape: f32[8,896], index: 10, kind: output, shape index: {0}]   ;;  %s3631_s11 = inlined_call_operand.hbm [shape: f32[8,256], index: 11, kind: output, shape index: {1}]  }
   0x1   :  { %18 = vsyncpa [#allocation6], 0 }
   0x2   :  { %19 = vsyncpa [#allocation9], 0 }
   0x3   :  { %20 = vsyncpa [#allocation12], 0 }
   0x4   :  { %21 = vsyncpa [#allocation4], 0 }
   0x5   :  { %22 = vsyncpa [#allocation16], 0  ;;  %s3366_s17 = smov [#allocation5]   ;;  %s3156_s21 = scalar_lea.hbm %s3621_s1, 14336 }
   0x6   :  { %s38_s18 = sshll.u32 %s3366_s17, 4  ;;  %p3157_p0 = scmp.ne.s32.totalorder %s3621_s1, %s3156_s21  ;;  %s39_s18 = int_to_ptr.vmem [resolvable:$true] %s38_s18 }
   0x7   :  { %p3160_p1 = scmp.lt.u32.totalorder %s3156_s21, %s3621_s1 }
   0x9   :  { %p3162_p2 = pnand %p3160_p1, %p3157_p0 }
   0xb   :  { %3165 = shalt.err (!%p3162_p2)
}
   0xc   :  { %s3166_s26 = scalar_lea.vmem %s39_s18, 14336  ;;  %p3171_p4 = scmp.lt.s32.totalorder %s39_s18, %s39_s18 }
   0xd   :  { %p3167_p3 = scmp.ne.s32.totalorder %s39_s18, %s3166_s26  ;;  %p3172_p5 = scmp.lt.s32.totalorder %s3166_s26, %s3166_s26 }
   0xf   :  { %p3173_p6 = por %p3172_p5, %p3171_p4 }
  0x11   :  { %p3174_p7 = pnand %p3173_p6, %p3167_p3 }
  0x13   :  { %3177 = shalt.err (!%p3174_p7)
}
  0x14   :  { %s3367_s27 = smov 128   ;;  %s3368_s28 = smov 8  }
  0x15   :  { %44 = dma.hbm_to_vmem [thread:$0]  %s3621_s1, 14336, %s39_s18, [#allocation6], %s3367_s27, %s3367_s27, %s3368_s28  }
  0x16   :  { %s3369_s12 = smov [#allocation8]   ;;  %s3370_s14 = smov [#allocation11]  }
  0x17   :  { %s60_s13 = sshll.u32 %s3369_s12, 4  ;;  %s82_s15 = sshll.u32 %s3370_s14, 4  ;;  %s61_s13 = int_to_ptr.vmem [resolvable:$true] %s60_s13  ;;  %s83_s15 = int_to_ptr.vmem [resolvable:$true] %s82_s15 }
  0x18   :  { %s3178_s19 = scalar_lea.hbm %s3623_s3, 4096 }
  0x19   :  { %p3179_p8 = scmp.ne.s32.totalorder %s3623_s3, %s3178_s19  ;;  %p3182_p9 = scmp.lt.u32.totalorder %s3178_s19, %s3623_s3 }
  0x1b   :  { %p3184_p10 = pnand %p3182_p9, %p3179_p8 }
  0x1d   :  { %3187 = shalt.err (!%p3184_p10)
}
  0x1e   :  { %s3188_s1 = scalar_lea.vmem %s61_s13, 4096  ;;  %p3193_p12 = scmp.lt.s32.totalorder %s61_s13, %s61_s13 }
  0x1f   :  { %p3189_p11 = scmp.ne.s32.totalorder %s61_s13, %s3188_s1  ;;  %p3194_p13 = scmp.lt.s32.totalorder %s3188_s1, %s3188_s1 }
  0x21   :  { %p3195_p0 = por %p3194_p13, %p3193_p12 }
  0x23   :  { %p3196_p1 = pnand %p3195_p0, %p3189_p11 }
  0x25   :  { %3199 = shalt.err (!%p3196_p1)
}
  0x26   :  { %66 = dma.hbm_to_vmem [thread:$0]  %s3623_s3, 4096, %s61_s13, [#allocation9], %s3367_s27, %s3367_s27, %s3368_s28  }
  0x27   :  { %s3200_s29 = scalar_lea.hbm %s3625_s5, 2048 }
  0x28   :  { %p3201_p2 = scmp.ne.s32.totalorder %s3625_s5, %s3200_s29  ;;  %p3204_p3 = scmp.lt.u32.totalorder %s3200_s29, %s3625_s5 }
  0x2a   :  { %p3206_p4 = pnand %p3204_p3, %p3201_p2 }
  0x2c   :  { %3209 = shalt.err (!%p3206_p4)
}
  0x2d   :  { %s3210_s17 = scalar_lea.vmem %s83_s15, 2048  ;;  %p3215_p6 = scmp.lt.s32.totalorder %s83_s15, %s83_s15 }
  0x2e   :  { %p3211_p5 = scmp.ne.s32.totalorder %s83_s15, %s3210_s17  ;;  %p3216_p7 = scmp.lt.s32.totalorder %s3210_s17, %s3210_s17 }
  0x30   :  { %p3217_p8 = por %p3216_p7, %p3215_p6 }
  0x32   :  { %p3218_p9 = pnand %p3217_p8, %p3211_p5 }
  0x34   :  { %3221 = shalt.err (!%p3218_p9)
}
  0x35   :  { %88 = dma.hbm_to_vmem [thread:$0]  %s3625_s5, 2048, %s83_s15, [#allocation12], %s3367_s27, %s3367_s27, %s3368_s28  }
  0x36   :  { %s3371_s19 = smov [#allocation2]   ;;  %s3372_s21 = smov [#allocation7]  }
  0x37   :  { %s29_s20 = sshll.u32 %s3371_s19, 4  ;;  %s51_s22 = sshll.u32 %s3372_s21, 4  ;;  %s30_s20 = int_to_ptr.vmem [resolvable:$true] %s29_s20  ;;  %s52_s22 = int_to_ptr.vmem [resolvable:$true] %s51_s22 }
  0x38   :  { %s3222_s18 = scalar_lea.hbm %s3620_s0, 448 }
  0x39   :  { %p3223_p10 = scmp.ne.s32.totalorder %s3620_s0, %s3222_s18  ;;  %p3226_p11 = scmp.lt.u32.totalorder %s3222_s18, %s3620_s0 }
  0x3b   :  { %p3228_p12 = pnand %p3226_p11, %p3223_p10 }
  0x3d   :  { %3231 = shalt.err (!%p3228_p12)
}
  0x3e   :  { %s3232_s5 = scalar_lea.vmem %s30_s20, 448  ;;  %p3237_p0 = scmp.lt.s32.totalorder %s30_s20, %s30_s20 }
  0x3f   :  { %p3233_p13 = scmp.ne.s32.totalorder %s30_s20, %s3232_s5  ;;  %p3238_p1 = scmp.lt.s32.totalorder %s3232_s5, %s3232_s5 }
  0x41   :  { %p3239_p2 = por %p3238_p1, %p3237_p0 }
  0x43   :  { %p3240_p3 = pnand %p3239_p2, %p3233_p13 }
  0x45   :  { %3243 = shalt.err (!%p3240_p3)
}
  0x46   :  { %32 = dma.hbm_to_vmem [thread:$0]  %s3620_s0, 448, %s30_s20, [#allocation3]  }
  0x47   :  { %s3244_s12 = scalar_lea.hbm %s3622_s2, 32 }
  0x48   :  { %p3245_p4 = scmp.ne.s32.totalorder %s3622_s2, %s3244_s12  ;;  %p3248_p5 = scmp.lt.u32.totalorder %s3244_s12, %s3622_s2 }
  0x4a   :  { %p3250_p6 = pnand %p3248_p5, %p3245_p4 }
  0x4c   :  { %3253 = shalt.err (!%p3250_p6)
}
  0x4d   :  { %s3254_s13 = scalar_lea.vmem %s52_s22, 32  ;;  %p3259_p8 = scmp.lt.s32.totalorder %s52_s22, %s52_s22 }
  0x4e   :  { %p3255_p7 = scmp.ne.s32.totalorder %s52_s22, %s3254_s13  ;;  %p3260_p9 = scmp.lt.s32.totalorder %s3254_s13, %s3254_s13 }
  0x50   :  { %p3261_p10 = por %p3260_p9, %p3259_p8 }
  0x52   :  { %p3262_p11 = pnand %p3261_p10, %p3255_p7 }
  0x54   :  { %3265 = shalt.err (!%p3262_p11)
}
  0x55   :  { %54 = dma.hbm_to_vmem [thread:$0]  %s3622_s2, 32, %s52_s22, [#allocation6]  }
  0x56   :  { %s3373_s20 = smov [#allocation10]   ;;  %s3374_s23 = smov [#allocation13]  }
  0x57   :  { %s73_s21 = sshll.u32 %s3373_s20, 4  ;;  %s96_s1 = sshll.u32 %s3374_s23, 4  ;;  %s74_s21 = int_to_ptr.vmem [resolvable:$true] %s73_s21  ;;  %s97_s1 = int_to_ptr.vmem [resolvable:$true] %s96_s1 }
  0x58   :  { %s3266_s25 = scalar_lea.hbm %s3624_s4, 32 }
  0x59   :  { %p3267_p12 = scmp.ne.s32.totalorder %s3624_s4, %s3266_s25  ;;  %p3270_p13 = scmp.lt.u32.totalorder %s3266_s25, %s3624_s4 }
  0x5b   :  { %p3272_p0 = pnand %p3270_p13, %p3267_p12 }
  0x5d   :  { %3275 = shalt.err (!%p3272_p0)
}
  0x5e   :  { %s3276_s2 = scalar_lea.vmem %s74_s21, 32  ;;  %p3281_p2 = scmp.lt.s32.totalorder %s74_s21, %s74_s21 }
  0x5f   :  { %p3277_p1 = scmp.ne.s32.totalorder %s74_s21, %s3276_s2  ;;  %p3282_p3 = scmp.lt.s32.totalorder %s3276_s2, %s3276_s2 }
  0x61   :  { %p3283_p4 = por %p3282_p3, %p3281_p2 }
  0x63   :  { %p3284_p5 = pnand %p3283_p4, %p3277_p1 }
  0x65   :  { %3287 = shalt.err (!%p3284_p5)
}
  0x66   :  { %76 = dma.hbm_to_vmem [thread:$0]  %s3624_s4, 32, %s74_s21, [#allocation9]  }
  0x67   :  { %s3288_s12 = scalar_lea.hbm %s3627_s7, 14336 }
  0x68   :  { %p3289_p6 = scmp.ne.s32.totalorder %s3627_s7, %s3288_s12  ;;  %p3292_p7 = scmp.lt.u32.totalorder %s3288_s12, %s3627_s7 }
  0x6a   :  { %p3294_p8 = pnand %p3292_p7, %p3289_p6 }
  0x6c   :  { %3297 = shalt.err (!%p3294_p8)
}
  0x6d   :  { %s3298_s13 = scalar_lea.vmem %s97_s1, 14336  ;;  %p3303_p10 = scmp.lt.s32.totalorder %s97_s1, %s97_s1 }
  0x6e   :  { %p3299_p9 = scmp.ne.s32.totalorder %s97_s1, %s3298_s13  ;;  %p3304_p11 = scmp.lt.s32.totalorder %s3298_s13, %s3298_s13 }
  0x70   :  { %p3305_p12 = por %p3304_p11, %p3303_p10 }
  0x72   :  { %p3306_p13 = pnand %p3305_p12, %p3299_p9 }
  0x74   :  { %3309 = shalt.err (!%p3306_p13)
}
  0x75   :  { %s3375_s4 = smov 448   ;;  %s3376_s0 = smov 28  }
  0x76   :  { %102 = dma.hbm_to_vmem [thread:$0]  %s3627_s7, 14336, %s97_s1, [#allocation12], %s3375_s4, %s3375_s4, %s3376_s0  }
  0x77   :  { %3354 = dma.done.wait [#allocation3], 448  }
  0x78   :  { %3355 = vsyncadd [#allocation3], 4294966848 }
  0x79   :  { %3356 = dma.done.wait [#allocation6], 14368  }
  0x7a   :  { %3357 = vsyncadd [#allocation6], 4294952928 }
  0x7b   :  { %3358 = dma.done.wait [#allocation9], 4128  }
  0x7c   :  { %3359 = vsyncadd [#allocation9], 4294963168 }
  0x7d   :  { %3360 = dma.done.wait [#allocation12], 16384  }
  0x7e   :  { %3361 = vsyncadd [#allocation12], 4294950912  ;;  %v2721_v0 = vld [vmem:[#allocation5 + $0x4] ss:$8 sps:$4 sm:$0xff]   ;;  %v2723_v1 = vld [vmem:[#allocation5] ss:$8 sps:$4 sm:$0xff]  }
  0x7f   :  { %842 = vmatprep.subr.bf16.mxu0 %v2721_v0  ;;  %v2724_v2 = vld [vmem:[#allocation5 + $0x14] ss:$8 sps:$4 sm:$0xff]   ;;  %v2726_v3 = vld [vmem:[#allocation5 + $0x10] ss:$8 sps:$4 sm:$0xff]   ;;  %v2727_v4 = vld [vmem:[#allocation5 + $0x24] ss:$8 sps:$4 sm:$0xff]  }
  0x80   :  { %843 = vmatpush1.bf16.msra.mxu0 %v2723_v1  ;;  %v2729_v5 = vld [vmem:[#allocation5 + $0x20] ss:$8 sps:$4 sm:$0xff]   ;;  %v2730_v6 = vld [vmem:[#allocation5 + $0x34] ss:$8 sps:$4 sm:$0xff]   ;;  %v2732_v7 = vld [vmem:[#allocation5 + $0x30] ss:$8 sps:$4 sm:$0xff]  }
  0x81   :  { %844 = vmatprep.subr.bf16.mxu0 %v2724_v2  ;;  %v2733_v8 = vld [vmem:[#allocation5 + $0x44] ss:$8 sps:$4 sm:$0xff]   ;;  %v2735_v9 = vld [vmem:[#allocation5 + $0x40] ss:$8 sps:$4 sm:$0xff]   ;;  %v2736_v10 = vld [vmem:[#allocation5 + $0x54] ss:$8 sps:$4 sm:$0xff]  }
  0x82   :  { %v2738_v11 = vld [vmem:[#allocation5 + $0x50] ss:$8 sps:$4 sm:$0xff]   ;;  %v2739_v12 = vld [vmem:[#allocation5 + $0x64] ss:$8 sps:$4 sm:$0xff]   ;;  %v2741_v15 = vld [vmem:[#allocation5 + $0x60] ss:$8 sps:$4 sm:$0xff]  }
  0x83   :  { %v129_v13 = vld [vmem:[#allocation2] sm:$0xff]  ;;  %v2742_v16 = vld [vmem:[#allocation5 + $0x74] ss:$8 sps:$4 sm:$0xff]   ;;  %v2744_v17 = vld [vmem:[#allocation5 + $0x70] ss:$8 sps:$4 sm:$0xff]  }
  0x84   :  { %845 = vmatpush1.bf16.msra.mxu0 %v2726_v3  ;;  %v2393_v14 = vcombine.high %v129_v13, %v129_v13  ;;  %v2745_v18 = vld [vmem:[#allocation5 + $0x84] ss:$8 sps:$4 sm:$0xff]   ;;  %v2747_v19 = vld [vmem:[#allocation5 + $0x80] ss:$8 sps:$4 sm:$0xff]   ;;  %v2748_v20 = vld [vmem:[#allocation5 + $0x94] ss:$8 sps:$4 sm:$0xff]   ;;  %v2392_v36 = vcombine.low %v129_v13, %v129_v13 }
  0x85   :  { %846 = vmatprep.subr.bf16.mxu0 %v2727_v4  ;;  %v2750_v21 = vld [vmem:[#allocation5 + $0x90] ss:$8 sps:$4 sm:$0xff]   ;;  %v2751_v22 = vld [vmem:[#allocation5 + $0xa4] ss:$8 sps:$4 sm:$0xff]   ;;  %v2753_v23 = vld [vmem:[#allocation5 + $0xa0] ss:$8 sps:$4 sm:$0xff]  }
  0x86   :  { %874 = vmatprep.mubr.bf16.mxu0 %v2393_v14  ;;  %v2754_v24 = vld [vmem:[#allocation5 + $0xb4] ss:$8 sps:$4 sm:$0xff]   ;;  %v2756_v25 = vld [vmem:[#allocation5 + $0xb0] ss:$8 sps:$4 sm:$0xff]   ;;  %v2757_v26 = vld [vmem:[#allocation5 + $0xc4] ss:$8 sps:$4 sm:$0xff]  }
  0x87   :  { %v2759_v27 = vld [vmem:[#allocation5 + $0xc0] ss:$8 sps:$4 sm:$0xff]   ;;  %v2760_v28 = vld [vmem:[#allocation5 + $0xd4] ss:$8 sps:$4 sm:$0xff]   ;;  %v2762_v29 = vld [vmem:[#allocation5 + $0xd0] ss:$8 sps:$4 sm:$0xff]  }
  0x88   :  { %847 = vmatpush1.bf16.msra.mxu0 %v2729_v5  ;;  %v2763_v30 = vld [vmem:[#allocation5 + $0xe4] ss:$8 sps:$4 sm:$0xff]   ;;  %v2765_v31 = vld [vmem:[#allocation5 + $0xe0] ss:$8 sps:$4 sm:$0xff]   ;;  %v2766_v32 = vld [vmem:[#allocation5 + $0xf4] ss:$8 sps:$4 sm:$0xff]  }
  0x89   :  { %848 = vmatprep.subr.bf16.mxu0 %v2730_v6  ;;  %v2768_v33 = vld [vmem:[#allocation5 + $0xf0] ss:$8 sps:$4 sm:$0xff]   ;;  %v2773_v34 = vld [vmem:[#allocation5 + $0x104] ss:$8 sps:$4 sm:$0xff]   ;;  %v2771_v37 = vld [vmem:[#allocation5 + $0x100] ss:$8 sps:$4 sm:$0xff]  }
  0x8a   :  { %v3533_v35 = vld [vmem:[#allocation2 + $0x8] sm:$0xff]  ;;  %v2776_v39 = vld [vmem:[#allocation5 + $0x114] ss:$8 sps:$4 sm:$0xff]   ;;  %v2777_v42 = vld [vmem:[#allocation5 + $0x120] ss:$8 sps:$4 sm:$0xff]  }
  0x8b   :  { %v2395_v38 = vcombine.high %v3533_v35, %v3533_v35  ;;  %v2774_v40 = vld [vmem:[#allocation5 + $0x110] ss:$8 sps:$4 sm:$0xff]   ;;  %v2779_v41 = vld [vmem:[#allocation5 + $0x124] ss:$8 sps:$4 sm:$0xff]   ;;  %v2782_v43 = vld [vmem:[#allocation5 + $0x134] ss:$8 sps:$4 sm:$0xff]  }
  0x8c   :  { %849 = vmatpush1.bf16.msra.mxu0 %v2732_v7  ;;  %v2780_v44 = vld [vmem:[#allocation5 + $0x130] ss:$8 sps:$4 sm:$0xff]   ;;  %v2785_v45 = vld [vmem:[#allocation5 + $0x144] ss:$8 sps:$4 sm:$0xff]   ;;  %v2783_v46 = vld [vmem:[#allocation5 + $0x140] ss:$8 sps:$4 sm:$0xff]  }
  0x8d   :  { %850 = vmatprep.subr.bf16.mxu0 %v2733_v8  ;;  %v2788_v47 = vld [vmem:[#allocation5 + $0x154] ss:$8 sps:$4 sm:$0xff]   ;;  %v2786_v48 = vld [vmem:[#allocation5 + $0x150] ss:$8 sps:$4 sm:$0xff]   ;;  %v2791_v49 = vld [vmem:[#allocation5 + $0x164] ss:$8 sps:$4 sm:$0xff]  }
  0x8e   :  { %v2789_v50 = vld [vmem:[#allocation5 + $0x160] ss:$8 sps:$4 sm:$0xff]   ;;  %v2794_v51 = vld [vmem:[#allocation5 + $0x174] ss:$8 sps:$4 sm:$0xff]   ;;  %v2792_v52 = vld [vmem:[#allocation5 + $0x170] ss:$8 sps:$4 sm:$0xff]  }
  0x8f   :  { %v2797_v53 = vld [vmem:[#allocation5 + $0x184] ss:$8 sps:$4 sm:$0xff]   ;;  %v2795_v54 = vld [vmem:[#allocation5 + $0x180] ss:$8 sps:$4 sm:$0xff]   ;;  %v2800_v55 = vld [vmem:[#allocation5 + $0x194] ss:$8 sps:$4 sm:$0xff]  }
  0x90   :  { %851 = vmatpush1.bf16.msra.mxu0 %v2735_v9  ;;  %v2896_v56 = vld [vmem:[#allocation8 + $0x4] ss:$8 sps:$4 sm:$0xff]   ;;  %v2898_v57 = vld [vmem:[#allocation8] ss:$8 sps:$4 sm:$0xff]   ;;  %v2899_v58 = vld [vmem:[#allocation8 + $0x14] ss:$8 sps:$4 sm:$0xff]  }
  0x91   :  { %852 = vmatprep.subr.bf16.mxu0 %v2736_v10  ;;  %v2798_v59 = vld [vmem:[#allocation5 + $0x190] ss:$8 sps:$4 sm:$0xff]   ;;  %v2803_v60 = vld [vmem:[#allocation5 + $0x1a4] ss:$8 sps:$4 sm:$0xff]   ;;  %1214 = vmatprep.subr.bf16.mxu1 %v2896_v56  ;;  %v2801_v63 = vld [vmem:[#allocation5 + $0x1a0] ss:$8 sps:$4 sm:$0xff]  }
  0x92   :  { %1215 = vmatpush1.bf16.msra.mxu1 %v2898_v57  ;;  %v2901_v61 = vld [vmem:[#allocation8 + $0x10] ss:$8 sps:$4 sm:$0xff]   ;;  %v2902_v62 = vld [vmem:[#allocation8 + $0x24] ss:$8 sps:$4 sm:$0xff]   ;;  %v2904_v1 = vld [vmem:[#allocation8 + $0x20] ss:$8 sps:$4 sm:$0xff]  }
  0x93   :  { %1216 = vmatprep.subr.bf16.mxu1 %v2899_v58  ;;  %v2806_v0 = vld [vmem:[#allocation5 + $0x1b4] ss:$8 sps:$4 sm:$0xff]   ;;  %v2804_v2 = vld [vmem:[#allocation5 + $0x1b0] ss:$8 sps:$4 sm:$0xff]   ;;  %v2809_v4 = vld [vmem:[#allocation5 + $0x1c4] ss:$8 sps:$4 sm:$0xff]  }
  0x94   :  { %853 = vmatpush1.bf16.msra.mxu0 %v2738_v11  ;;  %v2905_v3 = vld [vmem:[#allocation8 + $0x34] ss:$8 sps:$4 sm:$0xff]   ;;  %v2907_v5 = vld [vmem:[#allocation8 + $0x30] ss:$8 sps:$4 sm:$0xff]   ;;  %v2908_v6 = vld [vmem:[#allocation8 + $0x44] ss:$8 sps:$4 sm:$0xff]  }
  0x95   :  { %854 = vmatprep.subr.bf16.mxu0 %v2739_v12  ;;  %v2807_v7 = vld [vmem:[#allocation5 + $0x1c0] ss:$8 sps:$4 sm:$0xff]   ;;  %v2812_v8 = vld [vmem:[#allocation5 + $0x1d4] ss:$8 sps:$4 sm:$0xff]   ;;  %v2810_v11 = vld [vmem:[#allocation5 + $0x1d0] ss:$8 sps:$4 sm:$0xff]  }
  0x96   :  { %1217 = vmatpush1.bf16.msra.mxu1 %v2901_v61  ;;  %v2910_v9 = vld [vmem:[#allocation8 + $0x40] ss:$8 sps:$4 sm:$0xff]   ;;  %v2911_v10 = vld [vmem:[#allocation8 + $0x54] ss:$8 sps:$4 sm:$0xff]   ;;  %v2913_v13 = vld [vmem:[#allocation8 + $0x50] ss:$8 sps:$4 sm:$0xff]  }
  0x97   :  { %1218 = vmatprep.subr.bf16.mxu1 %v2902_v62  ;;  %v2815_v12 = vld [vmem:[#allocation5 + $0x1e4] ss:$8 sps:$4 sm:$0xff]   ;;  %v2851_v57 = vld [vmem:[#allocation5 + $0x2a0] ss:$8 sps:$4 sm:$0xff]   ;;  %v2856_v58 = vld [vmem:[#allocation5 + $0x2b4] ss:$8 sps:$4 sm:$0xff]  }
  0x98   :  { %855 = vmatpush1.bf16.msra.mxu0 %v2741_v15  ;;  %v2914_v14 = vld [vmem:[#allocation8 + $0x64] ss:$8 sps:$4 sm:$0xff]   ;;  %v2862_v62 = vld [vmem:[#allocation5 + $0x2d4] ss:$8 sps:$4 sm:$0xff]  }
  0x99   :  { %856 = vmatprep.subr.bf16.mxu0 %v2742_v16  ;;  %v2813_v15 = vld [vmem:[#allocation5 + $0x1e0] ss:$8 sps:$4 sm:$0xff]   ;;  %v2818_v16 = vld [vmem:[#allocation5 + $0x1f4] ss:$8 sps:$4 sm:$0xff]   ;;  %v2853_v56 = vld [vmem:[#allocation5 + $0x2a4] ss:$8 sps:$4 sm:$0xff]  }
  0x9a   :  { %1219 = vmatpush1.bf16.msra.mxu1 %v2904_v1  ;;  %v2857_v61 = vld [vmem:[#allocation5 + $0x2c0] ss:$8 sps:$4 sm:$0xff]  }
  0x9b   :  { %1220 = vmatprep.subr.bf16.mxu1 %v2905_v3  ;;  %v2863_v1 = vld [vmem:[#allocation5 + $0x2e0] ss:$8 sps:$4 sm:$0xff]   ;;  %v2866_v3 = vld [vmem:[#allocation5 + $0x2f0] ss:$8 sps:$4 sm:$0xff]  }
  0x9c   :  { %857 = vmatpush1.bf16.msra.mxu0 %v2744_v17  ;;  %v2916_v17 = vld [vmem:[#allocation8 + $0x60] ss:$8 sps:$4 sm:$0xff]  }
  0x9d   :  { %858 = vmatprep.subr.bf16.mxu0 %v2745_v18  ;;  %v2917_v18 = vld [vmem:[#allocation8 + $0x74] ss:$8 sps:$4 sm:$0xff]  }
  0x9e   :  { %1221 = vmatpush1.bf16.msra.mxu1 %v2907_v5 }
  0x9f   :  { %1222 = vmatprep.subr.bf16.mxu1 %v2908_v6  ;;  %v2871_v6 = vld [vmem:[#allocation5 + $0x300] ss:$8 sps:$4 sm:$0xff]  }
  0xa0   :  { %859 = vmatpush1.bf16.msra.mxu0 %v2747_v19  ;;  %v2816_v19 = vld [vmem:[#allocation5 + $0x1f0] ss:$8 sps:$4 sm:$0xff]  }
  0xa1   :  { %860 = vmatprep.subr.bf16.mxu0 %v2748_v20  ;;  %v2823_v20 = vld [vmem:[#allocation5 + $0x204] ss:$8 sps:$4 sm:$0xff]  }
  0xa2   :  { %1223 = vmatpush1.bf16.msra.mxu1 %v2910_v9  ;;  %v3377_v9 = vmov 0  }
  0xa3   :  { %1224 = vmatprep.subr.bf16.mxu1 %v2911_v10  ;;  %v2879_v10 = vld [vmem:[#allocation5 + $0x324] ss:$8 sps:$4 sm:$0xff]  }
  0xa4   :  { %861 = vmatpush1.bf16.msra.mxu0 %v2750_v21  ;;  %v3537_v21 = vld [vmem:[#allocation2 + $0x10] sm:$0xff] }
  0xa5   :  { %862 = vmatprep.subr.bf16.mxu0 %v2751_v22  ;;  %v2919_v22 = vld [vmem:[#allocation8 + $0x70] ss:$8 sps:$4 sm:$0xff]   ;;  %v2396_v5 = vcombine.low %v3537_v21, %v3537_v21 }
  0xa6   :  { %1225 = vmatpush1.bf16.msra.mxu1 %v2913_v13  ;;  %v2880_v13 = vld [vmem:[#allocation5 + $0x330] ss:$8 sps:$4 sm:$0xff]  }
  0xa7   :  { %1226 = vmatprep.subr.bf16.mxu1 %v2914_v14  ;;  %v2885_v14 = vld [vmem:[#allocation5 + $0x344] ss:$8 sps:$4 sm:$0xff]  }
  0xa8   :  { %863 = vmatpush1.bf16.msra.mxu0 %v2753_v23  ;;  %v2920_v23 = vld [vmem:[#allocation8 + $0x84] ss:$8 sps:$4 sm:$0xff]  }
  0xa9   :  { %864 = vmatprep.subr.bf16.mxu0 %v2754_v24  ;;  %v2821_v24 = vld [vmem:[#allocation5 + $0x200] ss:$8 sps:$4 sm:$0xff]  }
  0xaa   :  { %1227 = vmatpush1.bf16.msra.mxu1 %v2916_v17  ;;  %v2886_v17 = vld [vmem:[#allocation5 + $0x350] ss:$8 sps:$4 sm:$0xff]  }
  0xab   :  { %1228 = vmatprep.subr.bf16.mxu1 %v2917_v18  ;;  %v2891_v18 = vld [vmem:[#allocation5 + $0x364] ss:$8 sps:$4 sm:$0xff]  }
  0xac   :  { %865 = vmatpush1.bf16.msra.mxu0 %v2756_v25  ;;  %v2394_v25 = vcombine.low %v3533_v35, %v3533_v35  ;;  %v2832_v35 = vld [vmem:[#allocation5 + $0x234] ss:$8 sps:$4 sm:$0xff]  }
  0xad   :  { %866 = vmatprep.subr.bf16.mxu0 %v2757_v26  ;;  %v2826_v26 = vld [vmem:[#allocation5 + $0x214] ss:$8 sps:$4 sm:$0xff]  }
  0xae   :  { %1229 = vmatpush1.bf16.msra.mxu1 %v2919_v22  ;;  %v2895_v22 = vld [vmem:[#allocation2 + $0x18] ss:$0 sps:$4 sm:$0xff]  }
  0xaf   :  { %1230 = vmatprep.subr.bf16.mxu1 %v2920_v23  ;;  %v2938_v23 = vld [vmem:[#allocation8 + $0xe4] ss:$8 sps:$4 sm:$0xff]  }
  0xb0   :  { %867 = vmatpush1.bf16.msra.mxu0 %v2759_v27  ;;  %v2397_v27 = vcombine.high %v3537_v21, %v3537_v21  ;;  %v2892_v21 = vld [vmem:[#allocation5 + $0x370] ss:$8 sps:$4 sm:$0xff]  }
  0xb1   :  { %868 = vmatprep.subr.bf16.mxu0 %v2760_v28  ;;  %v2922_v28 = vld [vmem:[#allocation8 + $0x80] ss:$8 sps:$4 sm:$0xff]  }
  0xb2   :  { %1231 = vmatpush1.bf16.msra.mxu1 %v2922_v28  ;;  %v247_v28 = vlaneseq }
  0xb4   :  { %869 = vmatpush1.bf16.msra.mxu0 %v2762_v29  ;;  %v2923_v29 = vld [vmem:[#allocation8 + $0x94] ss:$8 sps:$4 sm:$0xff]  }
  0xb5   :  { %870 = vmatprep.subr.bf16.mxu0 %v2763_v30  ;;  %v2824_v30 = vld [vmem:[#allocation5 + $0x210] ss:$8 sps:$4 sm:$0xff]   ;;  %1232 = vmatprep.subr.bf16.mxu1 %v2923_v29  ;;  %v3545_v29 = vshrl.u32 %v247_v28, 7 }
  0xb8   :  { %871 = vmatpush1.bf16.msra.mxu0 %v2765_v31  ;;  %v2829_v31 = vld [vmem:[#allocation5 + $0x224] ss:$8 sps:$4 sm:$0xff]  }
  0xb9   :  { %872 = vmatprep.subr.bf16.mxu0 %v2766_v32  ;;  %v2925_v32 = vld [vmem:[#allocation8 + $0x90] ss:$8 sps:$4 sm:$0xff]  }
  0xba   :  { %1233 = vmatpush1.bf16.msra.mxu1 %v2925_v32  ;;  %v3551_v32 = vsub.s32 1, %v3545_v29 }
  0xbc   :  { %873 = vmatpush1.bf16.msra.mxu0 %v2768_v33  ;;  %v2926_v33 = vld [vmem:[#allocation8 + $0xa4] ss:$8 sps:$4 sm:$0xff]  }
  0xbd   :  { %883 = vmatprep.subr.bf16.mxu0 %v2773_v34  ;;  %v2827_v34 = vld [vmem:[#allocation5 + $0x220] ss:$8 sps:$4 sm:$0xff]   ;;  %1234 = vmatprep.subr.bf16.mxu1 %v2926_v33 }
  0xbf   :  { %875 = vmatmul.mubr.bf16.vlgmr.msra.gmra.mrb[0].mxu0 %v2392_v36  ;;  %v2928_v36 = vld [vmem:[#allocation8 + $0xa0] ss:$8 sps:$4 sm:$0xff]  }
  0xc0   :  { %884 = vmatpush1.bf16.msra.mxu0 %v2771_v37  ;;  %915 = vmatprep.mubr.bf16.mxu0 %v2395_v38  ;;  %v2929_v37 = vld [vmem:[#allocation8 + $0xb4] ss:$8 sps:$4 sm:$0xff]  }
  0xc1   :  { %885 = vmatprep.subr.bf16.mxu0 %v2776_v39  ;;  %v2830_v38 = vld [vmem:[#allocation5 + $0x230] ss:$8 sps:$4 sm:$0xff]   ;;  %v2835_v39 = vld [vmem:[#allocation5 + $0x244] ss:$8 sps:$4 sm:$0xff]   ;;  %1235 = vmatpush1.bf16.msra.mxu1 %v2928_v36 }
  0xc2   :  { %1236 = vmatprep.subr.bf16.mxu1 %v2929_v37 }
  0xc4   :  { %886 = vmatpush1.bf16.msra.mxu0 %v2774_v40  ;;  %v2931_v40 = vld [vmem:[#allocation8 + $0xb0] ss:$8 sps:$4 sm:$0xff]  }
  0xc5   :  { %887 = vmatprep.subr.bf16.mxu0 %v2779_v41  ;;  %v2932_v41 = vld [vmem:[#allocation8 + $0xc4] ss:$8 sps:$4 sm:$0xff]   ;;  %1237 = vmatpush1.bf16.msra.mxu1 %v2931_v40 }
  0xc6   :  { %1238 = vmatprep.subr.bf16.mxu1 %v2932_v41 }
  0xc8   :  { %888 = vmatpush1.bf16.msra.mxu0 %v2777_v42  ;;  %v2833_v42 = vld [vmem:[#allocation5 + $0x240] ss:$8 sps:$4 sm:$0xff]  }
  0xc9   :  { %889 = vmatprep.subr.bf16.mxu0 %v2782_v43  ;;  %v2838_v43 = vld [vmem:[#allocation5 + $0x254] ss:$8 sps:$4 sm:$0xff]  }
  0xcc   :  { %890 = vmatpush1.bf16.msra.mxu0 %v2780_v44  ;;  %v2934_v44 = vld [vmem:[#allocation8 + $0xc0] ss:$8 sps:$4 sm:$0xff]  }
  0xcd   :  { %891 = vmatprep.subr.bf16.mxu0 %v2785_v45  ;;  %v2935_v45 = vld [vmem:[#allocation8 + $0xd4] ss:$8 sps:$4 sm:$0xff]   ;;  %1239 = vmatpush1.bf16.msra.mxu1 %v2934_v44  ;;  %v2944_v44 = vld [vmem:[#allocation11] ss:$8 sps:$4 sm:$0xff]  }
  0xce   :  { %1240 = vmatprep.subr.bf16.mxu1 %v2935_v45 }
  0xd0   :  { %892 = vmatpush1.bf16.msra.mxu0 %v2783_v46  ;;  %v2836_v46 = vld [vmem:[#allocation5 + $0x250] ss:$8 sps:$4 sm:$0xff]  }
  0xd1   :  { %893 = vmatprep.subr.bf16.mxu0 %v2788_v47  ;;  %v2841_v47 = vld [vmem:[#allocation5 + $0x264] ss:$8 sps:$4 sm:$0xff]  }
  0xd4   :  { %894 = vmatpush1.bf16.msra.mxu0 %v2786_v48  ;;  %v2937_v48 = vld [vmem:[#allocation8 + $0xd0] ss:$8 sps:$4 sm:$0xff]  }
  0xd5   :  { %895 = vmatprep.subr.bf16.mxu0 %v2791_v49  ;;  %v2839_v49 = vld [vmem:[#allocation5 + $0x260] ss:$8 sps:$4 sm:$0xff]   ;;  %1241 = vmatpush1.bf16.msra.mxu1 %v2937_v48 }
  0xd6   :  { %1242 = vmatprep.subr.bf16.mxu1 %v2938_v23  ;;  %v2952_v48 = vld [vmem:[#allocation11 + $0x24] ss:$8 sps:$4 sm:$0xff]  }
  0xd7   :  { %v3049_v23 = vld [vmem:[#allocation13 + $0x2e8] ss:$28 sps:$4 sm:$0xff]  }
  0xd8   :  { %896 = vmatpush1.bf16.msra.mxu0 %v2789_v50  ;;  %v2844_v50 = vld [vmem:[#allocation5 + $0x274] ss:$8 sps:$4 sm:$0xff]  }
  0xd9   :  { %897 = vmatprep.subr.bf16.mxu0 %v2794_v51  ;;  %v2842_v51 = vld [vmem:[#allocation5 + $0x270] ss:$8 sps:$4 sm:$0xff]  }
  0xdc   :  { %898 = vmatpush1.bf16.msra.mxu0 %v2792_v52  ;;  %v2847_v52 = vld [vmem:[#allocation5 + $0x284] ss:$8 sps:$4 sm:$0xff]  }
  0xdd   :  { %899 = vmatprep.subr.bf16.mxu0 %v2797_v53  ;;  %v2845_v53 = vld [vmem:[#allocation5 + $0x280] ss:$8 sps:$4 sm:$0xff]  }
  0xe0   :  { %900 = vmatpush1.bf16.msra.mxu0 %v2795_v54  ;;  %v2850_v54 = vld [vmem:[#allocation5 + $0x294] ss:$8 sps:$4 sm:$0xff]  }
  0xe1   :  { %901 = vmatprep.subr.bf16.mxu0 %v2800_v55  ;;  %v2848_v55 = vld [vmem:[#allocation5 + $0x290] ss:$8 sps:$4 sm:$0xff]  }
  0xe4   :  { %902 = vmatpush1.bf16.msra.mxu0 %v2798_v59  ;;  %v2854_v59 = vld [vmem:[#allocation5 + $0x2b0] ss:$8 sps:$4 sm:$0xff]  }
  0xe5   :  { %903 = vmatprep.subr.bf16.mxu0 %v2803_v60  ;;  %v2859_v60 = vld [vmem:[#allocation5 + $0x2c4] ss:$8 sps:$4 sm:$0xff]  }
  0xe8   :  { %904 = vmatpush1.bf16.msra.mxu0 %v2801_v63  ;;  %v2860_v63 = vld [vmem:[#allocation5 + $0x2d0] ss:$8 sps:$4 sm:$0xff]  }
  0xe9   :  { %905 = vmatprep.subr.bf16.mxu0 %v2806_v0  ;;  %v2865_v0 = vld [vmem:[#allocation5 + $0x2e4] ss:$8 sps:$4 sm:$0xff]  }
  0xec   :  { %906 = vmatpush1.bf16.msra.mxu0 %v2804_v2  ;;  %v2868_v2 = vld [vmem:[#allocation5 + $0x2f4] ss:$8 sps:$4 sm:$0xff]  }
  0xed   :  { %907 = vmatprep.subr.bf16.mxu0 %v2809_v4  ;;  %v2873_v4 = vld [vmem:[#allocation5 + $0x304] ss:$8 sps:$4 sm:$0xff]  }
  0xf0   :  { %908 = vmatpush1.bf16.msra.mxu0 %v2807_v7  ;;  %v2876_v7 = vld [vmem:[#allocation5 + $0x314] ss:$8 sps:$4 sm:$0xff]  }
  0xf1   :  { %909 = vmatprep.subr.bf16.mxu0 %v2812_v8  ;;  %v2874_v8 = vld [vmem:[#allocation5 + $0x310] ss:$8 sps:$4 sm:$0xff]  }
  0xf4   :  { %910 = vmatpush1.bf16.msra.mxu0 %v2810_v11  ;;  %v2877_v11 = vld [vmem:[#allocation5 + $0x320] ss:$8 sps:$4 sm:$0xff]  }
  0xf5   :  { %911 = vmatprep.subr.bf16.mxu0 %v2815_v12  ;;  %v2882_v12 = vld [vmem:[#allocation5 + $0x334] ss:$8 sps:$4 sm:$0xff]  }
  0xf8   :  { %912 = vmatpush1.bf16.msra.mxu0 %v2813_v15  ;;  %v2883_v15 = vld [vmem:[#allocation5 + $0x340] ss:$8 sps:$4 sm:$0xff]  }
  0xf9   :  { %913 = vmatprep.subr.bf16.mxu0 %v2818_v16  ;;  %v2888_v16 = vld [vmem:[#allocation5 + $0x354] ss:$8 sps:$4 sm:$0xff]  }
  0xfc   :  { %914 = vmatpush1.bf16.msra.mxu0 %v2816_v19  ;;  %v2889_v19 = vld [vmem:[#allocation5 + $0x360] ss:$8 sps:$4 sm:$0xff]  }
  0xfd   :  { %924 = vmatprep.subr.bf16.mxu0 %v2823_v20  ;;  %v2894_v20 = vld [vmem:[#allocation5 + $0x374] ss:$8 sps:$4 sm:$0xff]  }
  0xff   :  { %916 = vmatmul.mubr.bf16.vlgmr.msra.gmra.mrb[0].mxu0 %v2394_v25  ;;  %v2941_v25 = vld [vmem:[#allocation8 + $0xf4] ss:$8 sps:$4 sm:$0xff]  }
 0x100   :  { %925 = vmatpush1.bf16.msra.mxu0 %v2821_v24  ;;  %956 = vmatprep.mubr.bf16.mxu0 %v2397_v27  ;;  %v2940_v24 = vld [vmem:[#allocation8 + $0xe0] ss:$8 sps:$4 sm:$0xff]  }
 0x101   :  { %926 = vmatprep.subr.bf16.mxu0 %v2826_v26  ;;  %1243 = vmatpush1.bf16.msra.mxu1 %v2940_v24  ;;  %v2943_v26 = vld [vmem:[#allocation8 + $0xf0] ss:$8 sps:$4 sm:$0xff]  }
 0x102   :  { %1244 = vmatprep.subr.bf16.mxu1 %v2941_v25  ;;  %v2946_v27 = vld [vmem:[#allocation11 + $0x4] ss:$8 sps:$4 sm:$0xff]   ;;  %v1042_v25 = vld [vmem:[#allocation10] sm:$0x3] }
 0x103   :  { %v3051_v24 = vld [vmem:[#allocation13 + $0x2ec] ss:$28 sps:$4 sm:$0xff]  }
 0x104   :  { %927 = vmatpush1.bf16.msra.mxu0 %v2824_v30  ;;  %v3548_v30 = vsub.s32 0, %v3545_v29 }
 0x105   :  { %928 = vmatprep.subr.bf16.mxu0 %v2829_v31  ;;  %1245 = vmatpush1.bf16.msra.mxu1 %v2943_v26  ;;  %v245_v31 = vld [vmem:[#allocation7] sm:$0x3] }
 0x106   :  { %1367 = vmatprep.subr.bf16.mxu1 %v2946_v27  ;;  %v250_v33 = vrot.slane %v245_v31, %v3548_v30  ;;  %v1047_v26 = vrot.slane %v1042_v25, %v3548_v30  ;;  %v1051_v27 = vrot.slane %v1042_v25, %v3551_v32  ;;  %v3064_v25 = vld [vmem:[#allocation13 + $0x8] ss:$28 sps:$4 sm:$0xff]  }
 0x108   :  { %929 = vmatpush1.bf16.msra.mxu0 %v2827_v34  ;;  %v254_v34 = vrot.slane %v245_v31, %v3551_v32 }
 0x109   :  { %930 = vmatprep.subr.bf16.mxu0 %v2832_v35 }
 0x10c   :  { %931 = vmatpush1.bf16.msra.mxu0 %v2830_v38 }
 0x10d   :  { %932 = vmatprep.subr.bf16.mxu0 %v2835_v39 }
 0x110   :  { %933 = vmatpush1.bf16.msra.mxu0 %v2833_v42 }
 0x111   :  { %934 = vmatprep.subr.bf16.mxu0 %v2838_v43 }
 0x114   :  { %935 = vmatpush1.bf16.msra.mxu0 %v2836_v46  ;;  %v2949_v46 = vld [vmem:[#allocation11 + $0x14] ss:$8 sps:$4 sm:$0xff]  }
 0x115   :  { %936 = vmatprep.subr.bf16.mxu0 %v2841_v47  ;;  %v2947_v47 = vld [vmem:[#allocation11 + $0x10] ss:$8 sps:$4 sm:$0xff]  }
 0x118   :  { %937 = vmatpush1.bf16.msra.mxu0 %v2839_v49  ;;  %v2950_v49 = vld [vmem:[#allocation11 + $0x20] ss:$8 sps:$4 sm:$0xff]  }
 0x119   :  { %938 = vmatprep.subr.bf16.mxu0 %v2844_v50  ;;  %v2955_v50 = vld [vmem:[#allocation11 + $0x34] ss:$8 sps:$4 sm:$0xff]  }
 0x11c   :  { %939 = vmatpush1.bf16.msra.mxu0 %v2842_v51  ;;  %v2953_v51 = vld [vmem:[#allocation11 + $0x30] ss:$8 sps:$4 sm:$0xff]  }
 0x11d   :  { %940 = vmatprep.subr.bf16.mxu0 %v2847_v52  ;;  %v2958_v52 = vld [vmem:[#allocation11 + $0x44] ss:$8 sps:$4 sm:$0xff]  }
 0x120   :  { %941 = vmatpush1.bf16.msra.mxu0 %v2845_v53  ;;  %v2956_v53 = vld [vmem:[#allocation11 + $0x40] ss:$8 sps:$4 sm:$0xff]  }
 0x121   :  { %942 = vmatprep.subr.bf16.mxu0 %v2850_v54  ;;  %v2961_v54 = vld [vmem:[#allocation11 + $0x54] ss:$8 sps:$4 sm:$0xff]  }
 0x124   :  { %943 = vmatpush1.bf16.msra.mxu0 %v2848_v55  ;;  %v2959_v55 = vld [vmem:[#allocation11 + $0x50] ss:$8 sps:$4 sm:$0xff]  }
 0x125   :  { %944 = vmatprep.subr.bf16.mxu0 %v2853_v56  ;;  %v2964_v56 = vld [vmem:[#allocation11 + $0x64] ss:$8 sps:$4 sm:$0xff]  }
 0x128   :  { %945 = vmatpush1.bf16.msra.mxu0 %v2851_v57  ;;  %v2962_v57 = vld [vmem:[#allocation11 + $0x60] ss:$8 sps:$4 sm:$0xff]  }
 0x129   :  { %946 = vmatprep.subr.bf16.mxu0 %v2856_v58  ;;  %v2967_v58 = vld [vmem:[#allocation11 + $0x74] ss:$8 sps:$4 sm:$0xff]  }
 0x12c   :  { %947 = vmatpush1.bf16.msra.mxu0 %v2854_v59  ;;  %v2965_v59 = vld [vmem:[#allocation11 + $0x70] ss:$8 sps:$4 sm:$0xff]  }
 0x12d   :  { %948 = vmatprep.subr.bf16.mxu0 %v2859_v60  ;;  %v2970_v60 = vld [vmem:[#allocation13 + $0x4] ss:$28 sps:$4 sm:$0xff]  }
 0x130   :  { %949 = vmatpush1.bf16.msra.mxu0 %v2857_v61  ;;  %v2971_v61 = vld [vmem:[#allocation13 + $0x10] ss:$28 sps:$4 sm:$0xff]  }
 0x131   :  { %950 = vmatprep.subr.bf16.mxu0 %v2862_v62  ;;  %v2973_v62 = vld [vmem:[#allocation13 + $0x14] ss:$28 sps:$4 sm:$0xff]  }
 0x134   :  { %951 = vmatpush1.bf16.msra.mxu0 %v2860_v63  ;;  %v2977_v63 = vld [vmem:[#allocation13 + $0x48] ss:$28 sps:$4 sm:$0xff]  }
 0x135   :  { %952 = vmatprep.subr.bf16.mxu0 %v2865_v0  ;;  %v2979_v0 = vld [vmem:[#allocation13 + $0x4c] ss:$28 sps:$4 sm:$0xff]  }
 0x138   :  { %953 = vmatpush1.bf16.msra.mxu0 %v2863_v1  ;;  %v2983_v1 = vld [vmem:[#allocation13 + $0x80] ss:$28 sps:$4 sm:$0xff]  }
 0x139   :  { %954 = vmatprep.subr.bf16.mxu0 %v2868_v2  ;;  %v2985_v2 = vld [vmem:[#allocation13 + $0x84] ss:$28 sps:$4 sm:$0xff]  }
 0x13c   :  { %955 = vmatpush1.bf16.msra.mxu0 %v2866_v3  ;;  %v2989_v3 = vld [vmem:[#allocation13 + $0xb8] ss:$28 sps:$4 sm:$0xff]  }
 0x13d   :  { %965 = vmatprep.subr.bf16.mxu0 %v2873_v4  ;;  %v2991_v4 = vld [vmem:[#allocation13 + $0xbc] ss:$28 sps:$4 sm:$0xff]  }
 0x13f   :  { %957 = vmatmul.mubr.bf16.vlgmr.msra.gmra.mrb[0].mxu0 %v2396_v5  ;;  %v2995_v5 = vld [vmem:[#allocation13 + $0xf0] ss:$28 sps:$4 sm:$0xff]  }
 0x140   :  { %966 = vmatpush1.bf16.msra.mxu0 %v2871_v6  ;;  %997 = vmatprep.mubr.bf16.mxu0 %v3377_v9  ;;  %v2997_v6 = vld [vmem:[#allocation13 + $0xf4] ss:$28 sps:$4 sm:$0xff]  }
 0x141   :  { %967 = vmatprep.subr.bf16.mxu0 %v2876_v7  ;;  %v3001_v7 = vld [vmem:[#allocation13 + $0x128] ss:$28 sps:$4 sm:$0xff]  }
 0x144   :  { %968 = vmatpush1.bf16.msra.mxu0 %v2874_v8  ;;  %v3003_v8 = vld [vmem:[#allocation13 + $0x12c] ss:$28 sps:$4 sm:$0xff]  }
 0x145   :  { %969 = vmatprep.subr.bf16.mxu0 %v2879_v10  ;;  %v3009_v10 = vld [vmem:[#allocation13 + $0x164] ss:$28 sps:$4 sm:$0xff]  }
 0x148   :  { %970 = vmatpush1.bf16.msra.mxu0 %v2877_v11  ;;  %v3013_v11 = vld [vmem:[#allocation13 + $0x198] ss:$28 sps:$4 sm:$0xff]  }
 0x149   :  { %971 = vmatprep.subr.bf16.mxu0 %v2882_v12  ;;  %v3015_v12 = vld [vmem:[#allocation13 + $0x19c] ss:$28 sps:$4 sm:$0xff]  }
 0x14c   :  { %972 = vmatpush1.bf16.msra.mxu0 %v2880_v13  ;;  %v3019_v13 = vld [vmem:[#allocation13 + $0x1d0] ss:$28 sps:$4 sm:$0xff]  }
 0x14d   :  { %973 = vmatprep.subr.bf16.mxu0 %v2885_v14  ;;  %v3021_v14 = vld [vmem:[#allocation13 + $0x1d4] ss:$28 sps:$4 sm:$0xff]  }
 0x150   :  { %974 = vmatpush1.bf16.msra.mxu0 %v2883_v15  ;;  %v3025_v15 = vld [vmem:[#allocation13 + $0x208] ss:$28 sps:$4 sm:$0xff]  }
 0x151   :  { %975 = vmatprep.subr.bf16.mxu0 %v2888_v16  ;;  %v3027_v16 = vld [vmem:[#allocation13 + $0x20c] ss:$28 sps:$4 sm:$0xff]  }
 0x154   :  { %976 = vmatpush1.bf16.msra.mxu0 %v2886_v17  ;;  %v3031_v17 = vld [vmem:[#allocation13 + $0x240] ss:$28 sps:$4 sm:$0xff]  }
 0x155   :  { %977 = vmatprep.subr.bf16.mxu0 %v2891_v18  ;;  %v3033_v18 = vld [vmem:[#allocation13 + $0x244] ss:$28 sps:$4 sm:$0xff]  }
 0x158   :  { %978 = vmatpush1.bf16.msra.mxu0 %v2889_v19  ;;  %v3037_v19 = vld [vmem:[#allocation13 + $0x278] ss:$28 sps:$4 sm:$0xff]  }
 0x159   :  { %979 = vmatprep.subr.bf16.mxu0 %v2894_v20  ;;  %v3039_v20 = vld [vmem:[#allocation13 + $0x27c] ss:$28 sps:$4 sm:$0xff]  }
 0x15c   :  { %980 = vmatpush1.bf16.msra.mxu0 %v2892_v21  ;;  %v3043_v21 = vld [vmem:[#allocation13 + $0x2b0] ss:$28 sps:$4 sm:$0xff]  }
 0x15d   :  { %2235 = vmatprep.subr.bf16.mxu0 %v2973_v62  ;;  %v3036_v62 = vld [vmem:[#allocation13 + $0x26c] ss:$28 sps:$4 sm:$0xff]  }
 0x15f   :  { %998 = vmatmul.mubr.bf16.vlgmr.msra.gmra.mrb[0].mxu0 %v2895_v22  ;;  %v3045_v22 = vld [vmem:[#allocation13 + $0x2b4] ss:$28 sps:$4 sm:$0xff]  }
 0x160   :  { %2236 = vmatpush1.bf16.msra.mxu0 %v2971_v61  ;;  %v3028_v61 = vld [vmem:[#allocation13 + $0x230] ss:$28 sps:$4 sm:$0xff]  }
 0x161   :  { %2237 = vmatprep.subr.bf16.mxu0 %v2979_v0  ;;  %v3042_v0 = vld [vmem:[#allocation13 + $0x2a4] ss:$28 sps:$4 sm:$0xff]  }
 0x164   :  { %2238 = vmatpush1.bf16.msra.mxu0 %v2977_v63  ;;  %v3034_v63 = vld [vmem:[#allocation13 + $0x268] ss:$28 sps:$4 sm:$0xff]  }
 0x165   :  { %2239 = vmatprep.subr.bf16.mxu0 %v2985_v2  ;;  %v3048_v2 = vld [vmem:[#allocation13 + $0x2dc] ss:$28 sps:$4 sm:$0xff]  }
 0x168   :  { %2240 = vmatpush1.bf16.msra.mxu0 %v2983_v1  ;;  %v3040_v1 = vld [vmem:[#allocation13 + $0x2a0] ss:$28 sps:$4 sm:$0xff]  }
 0x169   :  { %2241 = vmatprep.subr.bf16.mxu0 %v2991_v4  ;;  %v3054_v4 = vld [vmem:[#allocation13 + $0x314] ss:$28 sps:$4 sm:$0xff]  }
 0x16c   :  { %2242 = vmatpush1.bf16.msra.mxu0 %v2989_v3  ;;  %v3046_v3 = vld [vmem:[#allocation13 + $0x2d8] ss:$28 sps:$4 sm:$0xff]  }
 0x16d   :  { %2243 = vmatprep.subr.bf16.mxu0 %v2997_v6  ;;  %v3057_v6 = vld [vmem:[#allocation13 + $0x324] ss:$28 sps:$4 sm:$0xff]  }
 0x170   :  { %2244 = vmatpush1.bf16.msra.mxu0 %v2995_v5  ;;  %v3052_v5 = vld [vmem:[#allocation13 + $0x310] ss:$28 sps:$4 sm:$0xff]  }
 0x171   :  { %2245 = vmatprep.subr.bf16.mxu0 %v3003_v8  ;;  %v3060_v8 = vld [vmem:[#allocation13 + $0x34c] ss:$28 sps:$4 sm:$0xff]  }
 0x174   :  { %2246 = vmatpush1.bf16.msra.mxu0 %v3001_v7  ;;  %v3055_v7 = vld [vmem:[#allocation13 + $0x320] ss:$28 sps:$4 sm:$0xff]  }
 0x175   :  { %2247 = vmatprep.subr.bf16.mxu0 %v3009_v10  ;;  %v3063_v10 = vld [vmem:[#allocation13 + $0x35c] ss:$28 sps:$4 sm:$0xff]  }
 0x232   :  { %v999_v35 = vpop.f32.mrb[0].mxu0 }
 0x233   :  { %v2693_v36 = vadd.f32 %v999_v35, %v250_v33  ;;  %v1001_v37 = vpop.f32.mrb[1].mxu0 }
 0x234   :  { %v2694_v38 = vadd.f32 %v1001_v37, %v254_v34  ;;  %v1003_v39 = vpop.f32.mrb[2].mxu0  ;;  %v1255_v34 = vld [vmem:[%s3629_s9] sm:$0xff] }
 0x235   :  { %v1006_v40 = vmax.f32 %v2693_v36, 0.0  ;;  %v1004_v41 = vpop.f32.mrb[3].mxu0 }
 0x236   :  { %v1007_v42 = vmax.f32 %v2694_v38, 0.0 }
 0x237   :  { %v1008_v45 = vpack.c.bf16 %v1006_v40, %v1006_v40  ;;  %v2968_v40 = vld [vmem:[#allocation13] ss:$28 sps:$4 sm:$0xff]  }
 0x238   :  { %v1009_v43 = vpack.c.bf16 %v1007_v42, %v1007_v42  ;;  %v2976_v42 = vld [vmem:[#allocation13 + $0x3c] ss:$28 sps:$4 sm:$0xff]  }
 0x23a   :  { %1246 = vmatprep.mubr.bf16.mxu1 %v1009_v43  ;;  %v2974_v43 = vld [vmem:[#allocation13 + $0x38] ss:$28 sps:$4 sm:$0xff]  }
 0x23b   :  { %1247 = vmatmul.mubr.bf16.vlgmr.msra.gmra.mrb[0].mxu1 %v1008_v45  ;;  %v2980_v45 = vld [vmem:[#allocation13 + $0x70] ss:$28 sps:$4 sm:$0xff]  }
 0x23c   :  { %1368 = vmatpush1.bf16.msra.mxu1 %v2944_v44  ;;  %1399 = vmatprep.mubr.bf16.mxu1 %v3377_v9  ;;  %v3007_v9 = vld [vmem:[#allocation13 + $0x160] ss:$28 sps:$4 sm:$0xff]   ;;  %v2982_v44 = vld [vmem:[#allocation13 + $0x74] ss:$28 sps:$4 sm:$0xff]  }
 0x23d   :  { %1369 = vmatprep.subr.bf16.mxu1 %v2949_v46  ;;  %2248 = vmatpush1.bf16.msra.mxu0 %v3007_v9  ;;  %v2988_v46 = vld [vmem:[#allocation13 + $0xac] ss:$28 sps:$4 sm:$0xff]  }
 0x23e   :  { %2249 = vmatprep.subr.bf16.mxu0 %v3015_v12  ;;  %v3058_v9 = vld [vmem:[#allocation13 + $0x348] ss:$28 sps:$4 sm:$0xff]  }
 0x23f   :  { %v3066_v12 = vld [vmem:[#allocation13 + $0xc] ss:$28 sps:$4 sm:$0xff]  }
 0x240   :  { %1370 = vmatpush1.bf16.msra.mxu1 %v2947_v47  ;;  %v2986_v47 = vld [vmem:[#allocation13 + $0xa8] ss:$28 sps:$4 sm:$0xff]  }
 0x241   :  { %1371 = vmatprep.subr.bf16.mxu1 %v2952_v48  ;;  %2250 = vmatpush1.bf16.msra.mxu0 %v3013_v11  ;;  %v2994_v48 = vld [vmem:[#allocation13 + $0xe4] ss:$28 sps:$4 sm:$0xff]   ;;  %v3061_v11 = vld [vmem:[#allocation13 + $0x358] ss:$28 sps:$4 sm:$0xff]  }
 0x242   :  { %2251 = vmatprep.subr.bf16.mxu0 %v3021_v14 }
 0x244   :  { %1372 = vmatpush1.bf16.msra.mxu1 %v2950_v49  ;;  %v2992_v49 = vld [vmem:[#allocation13 + $0xe0] ss:$28 sps:$4 sm:$0xff]  }
 0x245   :  { %1373 = vmatprep.subr.bf16.mxu1 %v2955_v50  ;;  %2252 = vmatpush1.bf16.msra.mxu0 %v3019_v13  ;;  %v3000_v50 = vld [vmem:[#allocation13 + $0x11c] ss:$28 sps:$4 sm:$0xff]   ;;  %v1275_v13 = vld [vmem:[%s3626_s6] sm:$0x3] }
 0x246   :  { %2253 = vmatprep.subr.bf16.mxu0 %v3027_v16  ;;  %v1280_v14 = vrot.slane %v1275_v13, %v3548_v30 }
 0x248   :  { %1374 = vmatpush1.bf16.msra.mxu1 %v2953_v51  ;;  %v2998_v51 = vld [vmem:[#allocation13 + $0x118] ss:$28 sps:$4 sm:$0xff]  }
 0x249   :  { %1375 = vmatprep.subr.bf16.mxu1 %v2958_v52  ;;  %2254 = vmatpush1.bf16.msra.mxu0 %v3025_v15  ;;  %v3006_v52 = vld [vmem:[#allocation13 + $0x154] ss:$28 sps:$4 sm:$0xff]   ;;  %v1284_v15 = vrot.slane %v1275_v13, %v3551_v32  ;;  %v3581_v13 = vld [vmem:[%s3628_s8] sm:$0xff]  ;;  %s3378_s8 = smov [#allocation15]  }
 0x24a   :  { %2255 = vmatprep.subr.bf16.mxu0 %v3033_v18  ;;  %s2376_s18 = sshll.u32 %s3378_s8, 4  ;;  %s2377_s18 = int_to_ptr.vmem [resolvable:$true] %s2376_s18 }
 0x24b   :  { %s3310_s24 = scalar_lea.vmem %s2377_s18, 256  ;;  %p3315_p1 = scmp.lt.s32.totalorder %s2377_s18, %s2377_s18 }
 0x24c   :  { %1376 = vmatpush1.bf16.msra.mxu1 %v2956_v53  ;;  %v3004_v53 = vld [vmem:[#allocation13 + $0x150] ss:$28 sps:$4 sm:$0xff]   ;;  %p3311_p0 = scmp.ne.s32.totalorder %s2377_s18, %s3310_s24  ;;  %p3316_p2 = scmp.lt.s32.totalorder %s3310_s24, %s3310_s24 }
 0x24d   :  { %1377 = vmatprep.subr.bf16.mxu1 %v2961_v54  ;;  %2256 = vmatpush1.bf16.msra.mxu0 %v3031_v17  ;;  %v3012_v54 = vld [vmem:[#allocation13 + $0x18c] ss:$28 sps:$4 sm:$0xff]  }
 0x24e   :  { %2257 = vmatprep.subr.bf16.mxu0 %v3039_v20  ;;  %p3317_p3 = por %p3316_p2, %p3315_p1 }
 0x250   :  { %1378 = vmatpush1.bf16.msra.mxu1 %v2959_v55  ;;  %v3010_v55 = vld [vmem:[#allocation13 + $0x188] ss:$28 sps:$4 sm:$0xff]   ;;  %p3318_p4 = pnand %p3317_p3, %p3311_p0 }
 0x251   :  { %1379 = vmatprep.subr.bf16.mxu1 %v2964_v56  ;;  %2258 = vmatpush1.bf16.msra.mxu0 %v3037_v19  ;;  %v3018_v56 = vld [vmem:[#allocation13 + $0x1c4] ss:$28 sps:$4 sm:$0xff]  }
 0x252   :  { %2259 = vmatprep.subr.bf16.mxu0 %v3045_v22 }
 0x254   :  { %1380 = vmatpush1.bf16.msra.mxu1 %v2962_v57  ;;  %v3016_v57 = vld [vmem:[#allocation13 + $0x1c0] ss:$28 sps:$4 sm:$0xff]  }
 0x255   :  { %1381 = vmatprep.subr.bf16.mxu1 %v2967_v58  ;;  %2260 = vmatpush1.bf16.msra.mxu0 %v3043_v21  ;;  %v3024_v58 = vld [vmem:[#allocation13 + $0x1fc] ss:$28 sps:$4 sm:$0xff]  }
 0x256   :  { %2261 = vmatprep.subr.bf16.mxu0 %v3051_v24 }
 0x258   :  { %1382 = vmatpush1.bf16.msra.mxu1 %v2965_v59  ;;  %v3022_v59 = vld [vmem:[#allocation13 + $0x1f8] ss:$28 sps:$4 sm:$0xff]  }
 0x259   :  { %2153 = vmatprep.subr.bf16.mxu1 %v2970_v60  ;;  %2262 = vmatpush1.bf16.msra.mxu0 %v3049_v23  ;;  %v3030_v60 = vld [vmem:[#allocation13 + $0x234] ss:$28 sps:$4 sm:$0xff]  }
 0x25a   :  { %2263 = vmatprep.subr.bf16.mxu0 %v3057_v6  ;;  %v3122_v6 = vld [vmem:[#allocation13 + $0x2f0] ss:$28 sps:$4 sm:$0xff]  }
 0x25d   :  { %2264 = vmatpush1.bf16.msra.mxu0 %v3055_v7  ;;  %v3123_v7 = vld [vmem:[#allocation13 + $0x130] ss:$28 sps:$4 sm:$0xff]  }
 0x25e   :  { %2265 = vmatprep.subr.bf16.mxu0 %v3063_v10  ;;  %v3126_v10 = vld [vmem:[#allocation13 + $0x360] ss:$28 sps:$4 sm:$0xff]  }
 0x261   :  { %2266 = vmatpush1.bf16.msra.mxu0 %v3061_v11  ;;  %v3127_v11 = vld [vmem:[#allocation13 + $0x1a0] ss:$28 sps:$4 sm:$0xff]  }
 0x30e   :  { %v1248_v28 = vpop.f32.mrb[0].mxu1 }
 0x30f   :  { %v1249_v31 = vadd.f32 %v1248_v28, %v1047_v26  ;;  %v1250_v33 = vpop.f32.mrb[1].mxu1  ;;  %v3067_v28 = vld [vmem:[#allocation13 + $0x40] ss:$28 sps:$4 sm:$0xff]  }
 0x310   :  { %v1251_v35 = vadd.f32 %v1250_v33, %v1051_v27  ;;  %v1252_v36 = vpop.f32.mrb[2].mxu1  ;;  %v3069_v27 = vld [vmem:[#allocation13 + $0x44] ss:$28 sps:$4 sm:$0xff]   ;;  %v3070_v33 = vld [vmem:[#allocation13 + $0x78] ss:$28 sps:$4 sm:$0xff]  }
 0x311   :  { %2358 = vst [vmem:[#allocation15] sm:$0xff] %v1249_v31  ;;  %v1253_v37 = vpop.f32.mrb[3].mxu1  ;;  %v3078_v36 = vld [vmem:[#allocation13 + $0xec] ss:$28 sps:$4 sm:$0xff]  }
 0x312   :  { %v1256_v38 = vmul.f32 %v1255_v34, %v1251_v35  ;;  %2359 = vst [vmem:[#allocation15 + $0x8] sm:$0xff] %v1251_v35  ;;  %v3075_v34 = vld [vmem:[#allocation13 + $0xb4] ss:$28 sps:$4 sm:$0xff]   ;;  %v3076_v37 = vld [vmem:[#allocation13 + $0xe8] ss:$28 sps:$4 sm:$0xff]  }
 0x313   :  { %v3073_v35 = vld [vmem:[#allocation13 + $0xb0] ss:$28 sps:$4 sm:$0xff]  }
 0x314   :  { %v1257_v39 = vadd.f32 %v1256_v38, %v1249_v31  ;;  %v3072_v31 = vld [vmem:[#allocation13 + $0x7c] ss:$28 sps:$4 sm:$0xff]   ;;  %v3081_v38 = vld [vmem:[#allocation13 + $0x124] ss:$28 sps:$4 sm:$0xff]  }
 0x316   :  { %v1258_v41 = vpack.c.bf16 %v1257_v39, %v1257_v39  ;;  %v3079_v39 = vld [vmem:[#allocation13 + $0x120] ss:$28 sps:$4 sm:$0xff]  }
 0x318   :  { %1400 = vmatmul.mubr.bf16.vlgmr.msra.gmra.mrb[4].mxu1 %v1258_v41  ;;  %v3082_v41 = vld [vmem:[#allocation13 + $0x158] ss:$28 sps:$4 sm:$0xff]  }
 0x319   :  { %2154 = vmatpush1.bf16.msra.mxu1 %v2968_v40  ;;  %v3084_v40 = vld [vmem:[#allocation13 + $0x15c] ss:$28 sps:$4 sm:$0xff]  }
 0x31a   :  { %2155 = vmatprep.subr.bf16.mxu1 %v2976_v42  ;;  %v3087_v42 = vld [vmem:[#allocation13 + $0x194] ss:$28 sps:$4 sm:$0xff]  }
 0x31d   :  { %2156 = vmatpush1.bf16.msra.mxu1 %v2974_v43  ;;  %v3085_v43 = vld [vmem:[#allocation13 + $0x190] ss:$28 sps:$4 sm:$0xff]  }
 0x31e   :  { %2157 = vmatprep.subr.bf16.mxu1 %v2982_v44  ;;  %v3090_v44 = vld [vmem:[#allocation13 + $0x1cc] ss:$28 sps:$4 sm:$0xff]  }
 0x321   :  { %2158 = vmatpush1.bf16.msra.mxu1 %v2980_v45  ;;  %v3088_v45 = vld [vmem:[#allocation13 + $0x1c8] ss:$28 sps:$4 sm:$0xff]  }
 0x322   :  { %2159 = vmatprep.subr.bf16.mxu1 %v2988_v46  ;;  %v3093_v46 = vld [vmem:[#allocation13 + $0x204] ss:$28 sps:$4 sm:$0xff]  }
 0x325   :  { %2160 = vmatpush1.bf16.msra.mxu1 %v2986_v47  ;;  %v3091_v47 = vld [vmem:[#allocation13 + $0x200] ss:$28 sps:$4 sm:$0xff]  }
 0x326   :  { %2161 = vmatprep.subr.bf16.mxu1 %v2994_v48  ;;  %v3096_v48 = vld [vmem:[#allocation13 + $0x23c] ss:$28 sps:$4 sm:$0xff]  }
 0x329   :  { %2162 = vmatpush1.bf16.msra.mxu1 %v2992_v49  ;;  %v3094_v49 = vld [vmem:[#allocation13 + $0x238] ss:$28 sps:$4 sm:$0xff]  }
 0x32a   :  { %2163 = vmatprep.subr.bf16.mxu1 %v3000_v50  ;;  %v3099_v50 = vld [vmem:[#allocation13 + $0x274] ss:$28 sps:$4 sm:$0xff]  }
 0x32d   :  { %2164 = vmatpush1.bf16.msra.mxu1 %v2998_v51  ;;  %v3097_v51 = vld [vmem:[#allocation13 + $0x270] ss:$28 sps:$4 sm:$0xff]  }
 0x32e   :  { %2165 = vmatprep.subr.bf16.mxu1 %v3006_v52  ;;  %v3102_v52 = vld [vmem:[#allocation13 + $0x2ac] ss:$28 sps:$4 sm:$0xff]  }
 0x331   :  { %2166 = vmatpush1.bf16.msra.mxu1 %v3004_v53  ;;  %v3100_v53 = vld [vmem:[#allocation13 + $0x2a8] ss:$28 sps:$4 sm:$0xff]  }
 0x332   :  { %2167 = vmatprep.subr.bf16.mxu1 %v3012_v54  ;;  %v3105_v54 = vld [vmem:[#allocation13 + $0x2e4] ss:$28 sps:$4 sm:$0xff]  }
 0x335   :  { %2168 = vmatpush1.bf16.msra.mxu1 %v3010_v55  ;;  %v3103_v55 = vld [vmem:[#allocation13 + $0x2e0] ss:$28 sps:$4 sm:$0xff]  }
 0x336   :  { %2169 = vmatprep.subr.bf16.mxu1 %v3018_v56  ;;  %v3108_v56 = vld [vmem:[#allocation13 + $0x31c] ss:$28 sps:$4 sm:$0xff]  }
 0x339   :  { %2170 = vmatpush1.bf16.msra.mxu1 %v3016_v57  ;;  %v3106_v57 = vld [vmem:[#allocation13 + $0x318] ss:$28 sps:$4 sm:$0xff]  }
 0x33a   :  { %2171 = vmatprep.subr.bf16.mxu1 %v3024_v58  ;;  %v3111_v58 = vld [vmem:[#allocation13 + $0x354] ss:$28 sps:$4 sm:$0xff]  }
 0x33d   :  { %2172 = vmatpush1.bf16.msra.mxu1 %v3022_v59  ;;  %v3109_v59 = vld [vmem:[#allocation13 + $0x350] ss:$28 sps:$4 sm:$0xff]  }
 0x33e   :  { %2173 = vmatprep.subr.bf16.mxu1 %v3030_v60  ;;  %v3112_v60 = vld [vmem:[#allocation13 + $0x1d8] ss:$28 sps:$4 sm:$0xff]  }
 0x341   :  { %2174 = vmatpush1.bf16.msra.mxu1 %v3028_v61  ;;  %v3113_v61 = vld [vmem:[#allocation13 + $0x18] ss:$28 sps:$4 sm:$0xff]  }
 0x342   :  { %2175 = vmatprep.subr.bf16.mxu1 %v3036_v62  ;;  %v3114_v62 = vld [vmem:[#allocation13 + $0x210] ss:$28 sps:$4 sm:$0xff]  }
 0x345   :  { %2176 = vmatpush1.bf16.msra.mxu1 %v3034_v63  ;;  %v3115_v63 = vld [vmem:[#allocation13 + $0x50] ss:$28 sps:$4 sm:$0xff]  }
 0x346   :  { %2177 = vmatprep.subr.bf16.mxu1 %v3042_v0  ;;  %v3116_v0 = vld [vmem:[#allocation13 + $0x248] ss:$28 sps:$4 sm:$0xff]  }
 0x349   :  { %2178 = vmatpush1.bf16.msra.mxu1 %v3040_v1  ;;  %v3117_v1 = vld [vmem:[#allocation13 + $0x88] ss:$28 sps:$4 sm:$0xff]  }
 0x34a   :  { %2179 = vmatprep.subr.bf16.mxu1 %v3048_v2  ;;  %v3118_v2 = vld [vmem:[#allocation13 + $0x280] ss:$28 sps:$4 sm:$0xff]  }
 0x34d   :  { %2180 = vmatpush1.bf16.msra.mxu1 %v3046_v3  ;;  %v3119_v3 = vld [vmem:[#allocation13 + $0xc0] ss:$28 sps:$4 sm:$0xff]  }
 0x34e   :  { %2181 = vmatprep.subr.bf16.mxu1 %v3054_v4  ;;  %v3120_v4 = vld [vmem:[#allocation13 + $0x2b8] ss:$28 sps:$4 sm:$0xff]  }
 0x351   :  { %2182 = vmatpush1.bf16.msra.mxu1 %v3052_v5  ;;  %v3121_v5 = vld [vmem:[#allocation13 + $0xf8] ss:$28 sps:$4 sm:$0xff]  }
 0x352   :  { %2183 = vmatprep.subr.bf16.mxu1 %v3060_v8  ;;  %v3124_v8 = vld [vmem:[#allocation13 + $0x328] ss:$28 sps:$4 sm:$0xff]  }
 0x355   :  { %2184 = vmatpush1.bf16.msra.mxu1 %v3058_v9  ;;  %v3125_v9 = vld [vmem:[#allocation13 + $0x168] ss:$28 sps:$4 sm:$0xff]  }
 0x356   :  { %2194 = vmatprep.subr.bf16.mxu1 %v3066_v12  ;;  %v1560_v12 = vsub.s32 4, %v3545_v29 }
 0x3eb   :  { %v1401_v16 = vpop.f32.mrb[4].mxu1 }
 0x3ec   :  { %v1402_v17 = vadd.f32 %v1401_v16, %v1280_v14  ;;  %v1403_v18 = vpop.f32.mrb[5].mxu1  ;;  %v1564_v14 = vsub.s32 5, %v3545_v29  ;;  %v1561_v16 = vrot.slane %v3581_v13, %v1560_v12 }
 0x3ed   :  { %v1404_v19 = vadd.f32 %v1403_v18, %v1284_v15  ;;  %v1405_v20 = vpop.f32.mrb[6].mxu1  ;;  %v1545_v15 = vrot.slane %v3581_v13, %v3548_v30 }
 0x3ee   :  { %v1408_v21 = vmax.f32 %v1402_v17, 0.0  ;;  %v1406_v22 = vpop.f32.mrb[7].mxu1  ;;  %v1549_v17 = vrot.slane %v3581_v13, %v3551_v32  ;;  %v1565_v18 = vrot.slane %v3581_v13, %v1564_v14 }
 0x3ef   :  { %v1409_v23 = vmax.f32 %v1404_v19, 0.0 }
 0x3f0   :  { %v3567_v26 = vpack.c.bf16 %v1408_v21, %v1408_v21 }
 0x3f1   :  { %v3565_v24 = vpack.c.bf16 %v1409_v23, %v1409_v23 }
 0x3f3   :  { %2185 = vmatprep.mubr.bf16.mxu1 %v3565_v24  ;;  %2267 = vmatprep.mubr.bf16.mxu0 %v3565_v24 }
 0x3f4   :  { %2186 = vmatmul.mubr.bf16.vlgmr.msra.gmra.mrb[8].mxu1 %v3567_v26  ;;  %2268 = vmatmul.mubr.bf16.vlgmr.msra.gmra.mrb[4].mxu0 %v3567_v26 }
 0x3f5   :  { %2195 = vmatpush1.bf16.msra.mxu1 %v3064_v25  ;;  %2226 = vmatprep.mubr.bf16.mxu1 %v3565_v24 }
 0x3f6   :  { %2196 = vmatprep.subr.bf16.mxu1 %v3069_v27 }
 0x3f9   :  { %2197 = vmatpush1.bf16.msra.mxu1 %v3067_v28 }
 0x3fa   :  { %2198 = vmatprep.subr.bf16.mxu1 %v3072_v31 }
 0x3fd   :  { %2199 = vmatpush1.bf16.msra.mxu1 %v3070_v33 }
 0x3fe   :  { %2200 = vmatprep.subr.bf16.mxu1 %v3075_v34 }
 0x401   :  { %2201 = vmatpush1.bf16.msra.mxu1 %v3073_v35 }
 0x402   :  { %2202 = vmatprep.subr.bf16.mxu1 %v3078_v36 }
 0x405   :  { %2203 = vmatpush1.bf16.msra.mxu1 %v3076_v37 }
 0x406   :  { %2204 = vmatprep.subr.bf16.mxu1 %v3081_v38 }
 0x409   :  { %2205 = vmatpush1.bf16.msra.mxu1 %v3079_v39 }
 0x40a   :  { %2206 = vmatprep.subr.bf16.mxu1 %v3084_v40 }
 0x40d   :  { %2207 = vmatpush1.bf16.msra.mxu1 %v3082_v41 }
 0x40e   :  { %2208 = vmatprep.subr.bf16.mxu1 %v3087_v42 }
 0x411   :  { %2209 = vmatpush1.bf16.msra.mxu1 %v3085_v43 }
 0x412   :  { %2210 = vmatprep.subr.bf16.mxu1 %v3090_v44 }
 0x415   :  { %2211 = vmatpush1.bf16.msra.mxu1 %v3088_v45 }
 0x416   :  { %2212 = vmatprep.subr.bf16.mxu1 %v3093_v46 }
 0x419   :  { %2213 = vmatpush1.bf16.msra.mxu1 %v3091_v47 }
 0x41a   :  { %2214 = vmatprep.subr.bf16.mxu1 %v3096_v48 }
 0x41d   :  { %2215 = vmatpush1.bf16.msra.mxu1 %v3094_v49 }
 0x41e   :  { %2216 = vmatprep.subr.bf16.mxu1 %v3099_v50 }
 0x421   :  { %2217 = vmatpush1.bf16.msra.mxu1 %v3097_v51 }
 0x422   :  { %2218 = vmatprep.subr.bf16.mxu1 %v3102_v52 }
 0x425   :  { %2219 = vmatpush1.bf16.msra.mxu1 %v3100_v53 }
 0x426   :  { %2220 = vmatprep.subr.bf16.mxu1 %v3105_v54 }
 0x429   :  { %2221 = vmatpush1.bf16.msra.mxu1 %v3103_v55 }
 0x42a   :  { %2222 = vmatprep.subr.bf16.mxu1 %v3108_v56 }
 0x42d   :  { %2223 = vmatpush1.bf16.msra.mxu1 %v3106_v57 }
 0x42e   :  { %2224 = vmatprep.subr.bf16.mxu1 %v3111_v58 }
 0x431   :  { %2225 = vmatpush1.bf16.msra.mxu1 %v3109_v59 }
 0x432   :  { %2671 = vmatprep.subr.bf16.mxu1 %v3112_v60 }
 0x434   :  { %2227 = vmatmul.mubr.bf16.vlgmr.msra.gmra.mrb[12].mxu1 %v3567_v26 }
 0x435   :  { %2672 = vmatpush3.bf16.msra.mxu1 %v3113_v61  ;;  %2308 = vmatprep.mubr.bf16.mxu1 %v3565_v24 }
 0x436   :  { %2673 = vmatprep.subr.bf16.mxu1 %v3114_v62 }
 0x439   :  { %2674 = vmatpush3.bf16.msra.mxu1 %v3115_v63 }
 0x43a   :  { %2675 = vmatprep.subr.bf16.mxu1 %v3116_v0 }
 0x43d   :  { %2676 = vmatpush3.bf16.msra.mxu1 %v3117_v1 }
 0x43e   :  { %2677 = vmatprep.subr.bf16.mxu1 %v3118_v2 }
 0x441   :  { %2678 = vmatpush3.bf16.msra.mxu1 %v3119_v3 }
 0x442   :  { %2679 = vmatprep.subr.bf16.mxu1 %v3120_v4 }
 0x445   :  { %2680 = vmatpush3.bf16.msra.mxu1 %v3121_v5 }
 0x446   :  { %2681 = vmatprep.subr.bf16.mxu1 %v3122_v6 }
 0x449   :  { %2682 = vmatpush3.bf16.msra.mxu1 %v3123_v7 }
 0x44a   :  { %2683 = vmatprep.subr.bf16.mxu1 %v3124_v8 }
 0x44d   :  { %2684 = vmatpush3.bf16.msra.mxu1 %v3125_v9 }
 0x44e   :  { %2685 = vmatprep.subr.bf16.mxu1 %v3126_v10 }
 0x451   :  { %2686 = vmatpush3.bf16.msra.mxu1 %v3127_v11 }
 0x454   :  { %2309 = vmatmul.mubr.bf16.vlgmr.msra.gmra.mrb[16].mxu1 %v3567_v26 }
 0x4c7   :  { %v2187_v19 = vpop.f32.mrb[8].mxu1  ;;  %v2269_v20 = vpop.f32.mrb[4].mxu0 }
 0x4c8   :  { %v2188_v21 = vadd.f32 %v2187_v19, %v1545_v15  ;;  %v2270_v22 = vadd.f32 %v2269_v20, %v1561_v16  ;;  %v2189_v23 = vpop.f32.mrb[9].mxu1  ;;  %v2271_v24 = vpop.f32.mrb[5].mxu0 }
 0x4c9   :  { %v2190_v25 = vadd.f32 %v2189_v23, %v1549_v17  ;;  %v2272_v26 = vadd.f32 %v2271_v24, %v1565_v18  ;;  %v2191_v27 = vpop.f32.mrb[10].mxu1  ;;  %v2273_v28 = vpop.f32.mrb[6].mxu0 }
 0x4ca   :  { %v2316_v30 = vsub.f32 0.0, %v2188_v21  ;;  %v2320_v31 = vsub.f32 0.0, %v2270_v22  ;;  %v2192_v33 = vpop.f32.mrb[11].mxu1  ;;  %v2274_v34 = vpop.f32.mrb[7].mxu0 }
 0x4cb   :  { %v2317_v32 = vsub.f32 0.0, %v2190_v25  ;;  %v2321_v35 = vsub.f32 0.0, %v2272_v26 }
 0x4cc   :  { %3321 = shalt.err (!%p3318_p4)
}
 0x4cd   :  { %s3322_s29 = scalar_lea.hbm %s3631_s11, 256 }
 0x4ce   :  { %p3323_p5 = scmp.ne.s32.totalorder %s3631_s11, %s3322_s29  ;;  %p3326_p6 = scmp.lt.u32.totalorder %s3322_s29, %s3631_s11 }
 0x4d0   :  { %p3328_p7 = pnand %p3326_p6, %p3323_p5 }
 0x4d2   :  { %3331 = shalt.err (!%p3328_p7)
}
 0x4d3   :  { %2379 = dma.vmem_to_hbm [thread:$0]  %s2377_s18, 256, %s3631_s11, [#allocation16]   ;;  %v2323_v36 = vmul.f32 1.442695, %v2316_v30  ;;  %v2331_v37 = vmul.f32 1.442695, %v2320_v31 }
 0x4d4   :  { %v2325_v38 = vmul.f32 1.442695, %v2317_v32  ;;  %v2333_v39 = vmul.f32 1.442695, %v2321_v35  ;;  %v1552_v52 = vsub.s32 2, %v3545_v29  ;;  %v1556_v53 = vsub.s32 3, %v3545_v29 }
 0x4d5   :  { %3128 = vpow2.f32 %v2323_v36  ;;  %v1568_v6 = vsub.s32 6, %v3545_v29  ;;  %s3379_s11 = smov [#allocation14]  }
 0x4d6   :  { %3130 = vpow2.f32 %v2331_v37  ;;  %v1553_v54 = vrot.slane %v3581_v13, %v1552_v52  ;;  %v1557_v55 = vrot.slane %v3581_v13, %v1556_v53  ;;  %s2366_s30 = sshll.u32 %s3379_s11, 4  ;;  %s2367_s30 = int_to_ptr.vmem [resolvable:$true] %s2366_s30 }
 0x4d7   :  { %3132 = vpow2.f32 %v2325_v38  ;;  %v1569_v10 = vrot.slane %v3581_v13, %v1568_v6  ;;  %s3332_s12 = scalar_lea.vmem %s2367_s30, 896  ;;  %p3337_p9 = scmp.lt.s32.totalorder %s2367_s30, %s2367_s30 }
 0x4d8   :  { %3134 = vpow2.f32 %v2333_v39  ;;  %p3333_p8 = scmp.ne.s32.totalorder %s2367_s30, %s3332_s12  ;;  %p3338_p10 = scmp.lt.s32.totalorder %s3332_s12, %s3332_s12 }
 0x4da   :  { %p3339_p11 = por %p3338_p10, %p3337_p9 }
 0x4dc   :  { %p3340_p12 = pnand %p3339_p11, %p3333_p8 }
 0x4df   :  { %v3129_v40 = vpop.eup %3128 }
 0x4e0   :  { %v3131_v41 = vpop.eup %3130  ;;  %v2337_v42 = vadd.f32 1.0, %v3129_v40 }
 0x4e1   :  { %v3133_v43 = vpop.eup %3132  ;;  %v2341_v44 = vadd.f32 1.0, %v3131_v41 }
 0x4e2   :  { %v3135_v45 = vpop.eup %3134  ;;  %3136 = vrcp.f32 %v2337_v42  ;;  %v2338_v46 = vadd.f32 1.0, %v3133_v43 }
 0x4e3   :  { %3138 = vrcp.f32 %v2341_v44  ;;  %v2342_v47 = vadd.f32 1.0, %v3135_v45 }
 0x4e4   :  { %3140 = vrcp.f32 %v2338_v46 }
 0x4e5   :  { %3142 = vrcp.f32 %v2342_v47 }
 0x4ec   :  { %v3137_v48 = vpop.eup %3136 }
 0x4ed   :  { %v3139_v49 = vpop.eup %3138  ;;  %2351 = vst [vmem:[#allocation14] sm:$0xff] %v3137_v48 }
 0x4ee   :  { %v3141_v50 = vpop.eup %3140  ;;  %2355 = vst [vmem:[#allocation14 + $0x20] sm:$0xff] %v3139_v49 }
 0x4ef   :  { %v3143_v51 = vpop.eup %3142  ;;  %2352 = vst [vmem:[#allocation14 + $0x8] sm:$0xff] %v3141_v50 }
 0x4f0   :  { %2356 = vst [vmem:[#allocation14 + $0x28] sm:$0xff] %v3143_v51 }
 0x507   :  { %v2228_v56 = vpop.f32.mrb[12].mxu1 }
 0x508   :  { %v2229_v57 = vadd.f32 %v2228_v56, %v1553_v54  ;;  %v2230_v58 = vpop.f32.mrb[13].mxu1 }
 0x509   :  { %v2231_v59 = vadd.f32 %v2230_v58, %v1557_v55  ;;  %v2232_v60 = vpop.f32.mrb[14].mxu1 }
 0x50a   :  { %v2318_v61 = vsub.f32 0.0, %v2229_v57  ;;  %v2233_v62 = vpop.f32.mrb[15].mxu1 }
 0x50b   :  { %v2319_v63 = vsub.f32 0.0, %v2231_v59 }
 0x50c   :  { %v2327_v0 = vmul.f32 1.442695, %v2318_v61 }
 0x50d   :  { %v2329_v1 = vmul.f32 1.442695, %v2319_v63 }
 0x50e   :  { %3144 = vpow2.f32 %v2327_v0 }
 0x50f   :  { %3146 = vpow2.f32 %v2329_v1 }
 0x518   :  { %v3145_v2 = vpop.eup %3144 }
 0x519   :  { %v3147_v3 = vpop.eup %3146  ;;  %v2339_v4 = vadd.f32 1.0, %v3145_v2 }
 0x51a   :  { %v2340_v5 = vadd.f32 1.0, %v3147_v3 }
 0x51b   :  { %3148 = vrcp.f32 %v2339_v4 }
 0x51c   :  { %3150 = vrcp.f32 %v2340_v5 }
 0x525   :  { %v3149_v7 = vpop.eup %3148 }
 0x526   :  { %v3151_v8 = vpop.eup %3150  ;;  %2353 = vst [vmem:[#allocation14 + $0x10] sm:$0xff] %v3149_v7 }
 0x527   :  { %2354 = vst [vmem:[#allocation14 + $0x18] sm:$0xff] %v3151_v8  ;;  %v2687_v9 = vpop.f32.mrb[16].mxu1 }
 0x528   :  { %v2688_v11 = vpop.f32.mrb[17].mxu1 }
 0x529   :  { %v2689_v12 = vadd.f32 %v2688_v11, %v2687_v9  ;;  %v2690_v14 = vpop.f32.mrb[18].mxu1 }
 0x52a   :  { %v2691_v15 = vpop.f32.mrb[19].mxu1 }
 0x52b   :  { %v2311_v16 = vadd.f32 %v2689_v12, %v1569_v10 }
 0x52d   :  { %v2322_v17 = vsub.f32 0.0, %v2311_v16 }
 0x52f   :  { %v2335_v18 = vmul.f32 1.442695, %v2322_v17 }
 0x531   :  { %3152 = vpow2.f32 %v2335_v18 }
 0x53b   :  { %v3153_v19 = vpop.eup %3152 }
 0x53c   :  { %v2343_v20 = vadd.f32 1.0, %v3153_v19 }
 0x53e   :  { %3154 = vrcp.f32 %v2343_v20 }
 0x548   :  { %v3155_v29 = vpop.eup %3154 }
 0x549   :  { %2357 = vst [vmem:[#allocation14 + $0x30] sm:$0xff] %v3155_v29 }
 0x54a   :  { %3343 = shalt.err (!%p3340_p12)
}
 0x54b   :  { %s3344_s17 = scalar_lea.hbm %s3630_s10, 896 }
 0x54c   :  { %p3345_p13 = scmp.ne.s32.totalorder %s3630_s10, %s3344_s17  ;;  %p3348_p0 = scmp.lt.u32.totalorder %s3344_s17, %s3630_s10 }
 0x54e   :  { %p3350_p1 = pnand %p3348_p0, %p3345_p13 }
 0x550   :  { %3353 = shalt.err (!%p3350_p1)
}
 0x551   :  { %2369 = dma.vmem_to_hbm [thread:$0]  %s2367_s30, 896, %s3630_s10, [#allocation4]  }
 0x552   :  { %3362 = dma.done.wait [#allocation4], 896  }
 0x553   :  { %3363 = vsyncadd [#allocation4], 4294966400 }
 0x554   :  { %3364 = dma.done.wait [#allocation16], 256  }
 0x555   :  { %3365 = vsyncadd [#allocation16], 4294967040 }
 0x556   :  { %2386 = vsyncpa [#allocation3], 1 }
 0x557   :  { %2387 = vsyncpa [#allocation6], 1 }
 0x558   :  { %2388 = vsyncpa [#allocation9], 1 }
 0x559   :  { %2389 = vsyncpa [#allocation12], 1 }
 0x55a   :  { %2390 = vsyncpa [#allocation4], 1 }
 0x55b   :  { %2391 = vsyncpa [#allocation16], 1 }

</bundles_post_ra>
